<compile_context>
chip_gen: v6e
topology: v6e:2x2x1
jax: 0.10.0
libtpu: 0.0.40
codegen_flags: <defaults>
</compile_context>

<pallas_src>
import functools

import numpy as np
import jax
import jax.numpy as jnp
from jax import lax
from jax.experimental import pallas as pl
from jax.experimental.pallas import tpu as pltpu

EPS = np.float32(1e-4)
MP_SILU_SCALE = np.float32(1.0 / 0.596)
INV_SQRT2 = np.float32(1.0 / np.sqrt(2.0))
LANE = 128


# ---------------------------------------------------------------------------
# In-kernel helpers
# ---------------------------------------------------------------------------

def _silu_f32(x):
    x = x.astype(jnp.float32)
    return (x * jax.nn.sigmoid(x)) * MP_SILU_SCALE              # mp_silu


def _norm_weight(w, cin, gain=1.0):
    """MP_GeoLinear weight normalization: w / (eps + ||row||/sqrt(cin)) * gain/sqrt(cin)."""
    w = w.astype(jnp.float32)
    rn = jnp.sqrt(jnp.sum(w * w, axis=1, keepdims=True))
    w_hat = w / (EPS + rn * np.float32(1.0 / np.sqrt(cin)))
    return w_hat * np.float32(gain / np.sqrt(cin))


def _matmul_wt(x, w_hat):
    # x @ w_hat.T on the MXU, f32 accumulation
    return lax.dot_general(x, w_hat, (((1,), (1,)), ((), ())),
                           preferred_element_type=jnp.float32)


# ---------------------------------------------------------------------------
# Pallas kernels
# ---------------------------------------------------------------------------

def _geolinear_kernel(x_ref, w_ref, o_ref, *, cin, gain, normalize_in):
    x = x_ref[...].astype(jnp.float32)
    if normalize_in:                                            # fused normalize(x, dim=1)
        nrm = jnp.sqrt(jnp.sum(x * x, axis=1, keepdims=True))
        x = x / (EPS + nrm * np.float32(1.0 / np.sqrt(cin)))
    # Weight norm is recomputed per row tile (cheap EUP/XLU work hidden under the matmul);
    # hoisting into a pl.when(pid==0)-initialized scratch is unsafe with a "parallel" axis.
    w_hat = _norm_weight(w_ref[...], cin, gain)
    o_ref[...] = _matmul_wt(x, w_hat).astype(o_ref.dtype)


def _lin_out_gain_kernel(x_ref, w_ref, g_ref, y_ref, o_ref, *, cin):
    """Final MP_GeoLinear for image nodes: emits graph embedding y and y * cond_gain."""
    w_hat = _norm_weight(w_ref[...], cin)
    y = _matmul_wt(x_ref[...].astype(jnp.float32), w_hat)
    y_ref[...] = y.astype(y_ref.dtype)
    o_ref[...] = (y * g_ref[0, 0]).astype(o_ref.dtype)


def _fused_hip_layer_kernel(*refs, n_edges, cemb):
    """One hetero GNN layer for a single destination node type.

    refs = [hid_dst, (adj_e, hid_src_e, w_neigh_e, w_res_e, gate_e) * n_edges, out]
    Computes: out = sum_e [ silu(hid_dst) @ Wr_e^T * gate_e + (adj_e @ silu(hid_src_e)) @ Wn_e^T ]
    where adj_e and gate_e already carry the mp_sum 1/sqrt(2), the deg==0 residual passthrough
    and the hetero mp_scaling factors (folded at graph-build time).
    """
    hid_d_ref = refs[0]
    out_ref = refs[-1]
    act_d = _silu_f32(hid_d_ref[...])                           # heterogenous_mp_silu (dst)
    acc = None
    for e in range(n_edges):
        adj_ref, src_ref, wn_ref, wr_ref, gate_ref = refs[1 + 5 * e: 6 + 5 * e]
        wn = _norm_weight(wn_ref[...], cemb)                    # lin_neighbour
        wr = _norm_weight(wr_ref[...], cemb)                    # lin_res
        act_s = _silu_f32(src_ref[...])                         # heterogenous_mp_silu (src)
        adj = adj_ref[...]
        nd_tile, ns = adj.shape
        if ns < nd_tile:        # small source: project first, then aggregate (fewer FLOPs)
            neigh = jnp.dot(adj, _matmul_wt(act_s, wn), preferred_element_type=jnp.float32)
        else:                   # aggregate first, then project
            agg = jnp.dot(adj, act_s, preferred_element_type=jnp.float32)
            neigh = _matmul_wt(agg, wn)
        res = _matmul_wt(act_d, wr)
        term = res * gate_ref[...] + neigh                      # mp_sum + where(deg>0) folded
        acc = term if acc is None else acc + term               # hetero aggr='sum'
    out_ref[...] = acc.astype(out_ref.dtype)                    # mp_scaling already folded


# ---------------------------------------------------------------------------
# pallas_call wrappers
# ---------------------------------------------------------------------------

def _row_tile(n, target=256):
    if n <= target:
        return n
    t = target
    while t >= 8:
        if n % t == 0:
            return t
        t -= 8
    return n


def _pad_cout(w, mult=LANE):
    """Zero-pad the output rows of a GeoLinear weight up to a multiple of 128 so the kernel's
    output store is lane-dense.  Padded rows normalize to exactly 0 (||row||=0 -> 0/eps)."""
    pad = (-w.shape[0]) % mult
    if pad:
        w = jnp.concatenate([w, jnp.zeros((pad, w.shape[1]), w.dtype)], axis=0)
    return w


def geolinear(x, w, *, gain=1.0, normalize_in=False, lane_pad=False):
    n, cin = x.shape
    if lane_pad:
        w = _pad_cout(w)
    cout = w.shape[0]
    tile = _row_tile(n)
    return pl.pallas_call(
        functools.partial(_geolinear_kernel, cin=cin, gain=gain, normalize_in=normalize_in),
        out_shape=jax.ShapeDtypeStruct((n, cout), jnp.float32),
        grid=(n // tile,),
        in_specs=[pl.BlockSpec((tile, cin), lambda i: (i, 0)),
                  pl.BlockSpec((cout, cin), lambda i: (0, 0))],
        out_specs=pl.BlockSpec((tile, cout), lambda i: (i, 0)),
        compiler_params=pltpu.CompilerParams(dimension_semantics=("parallel",)),
    )(x, w)


def lin_out_with_gain(x, w, cond_gain):
    """Final image-node GeoLinear fused with cond_gain (dual output, lane-dense padded cout)."""
    n, cin = x.shape
    w = _pad_cout(w)
    cout = w.shape[0]
    tile = _row_tile(n)
    g = jnp.reshape(cond_gain.astype(jnp.float32), (1, 1))
    y, o = pl.pallas_call(
        functools.partial(_lin_out_gain_kernel, cin=cin),
        out_shape=(jax.ShapeDtypeStruct((n, cout), jnp.float32),
                   jax.ShapeDtypeStruct((n, cout), jnp.float32)),
        grid=(n // tile,),
        in_specs=[pl.BlockSpec((tile, cin), lambda i: (i, 0)),
                  pl.BlockSpec((cout, cin), lambda i: (0, 0)),
                  pl.BlockSpec(memory_space=pltpu.MemorySpace.SMEM)],   # scalar cond_gain
        out_specs=(pl.BlockSpec((tile, cout), lambda i: (i, 0)),
                   pl.BlockSpec((tile, cout), lambda i: (i, 0))),
        compiler_params=pltpu.CompilerParams(dimension_semantics=("parallel",)),
    )(x, w, g)
    return y, o


def fused_hip_layer(hid_dst, edge_inputs):
    """One fused GNN layer for a single destination node type.
    edge_inputs: list of (adj_folded, hid_src, w_neigh, w_res, gate_folded)."""
    nd, cemb = hid_dst.shape
    tile = _row_tile(nd)
    in_specs = [pl.BlockSpec((tile, cemb), lambda i: (i, 0))]
    args = [hid_dst]
    for adj, hid_src, wn, wr, gate in edge_inputs:
        ns = hid_src.shape[0]
        in_specs += [
            pl.BlockSpec((tile, ns), lambda i: (i, 0)),     # adjacency rows for this dst tile
            pl.BlockSpec((ns, cemb), lambda i: (0, 0)),     # full source features
            pl.BlockSpec((cemb, cemb), lambda i: (0, 0)),   # w_neigh
            pl.BlockSpec((cemb, cemb), lambda i: (0, 0)),   # w_res
            pl.BlockSpec((tile, 1), lambda i: (i, 0)),      # folded residual gate
        ]
        args += [adj, hid_src, wn, wr, gate]
    return pl.pallas_call(
        functools.partial(_fused_hip_layer_kernel, n_edges=len(edge_inputs), cemb=cemb),
        out_shape=jax.ShapeDtypeStruct((nd, cemb), jnp.float32),
        grid=(nd // tile,),
        in_specs=in_specs,
        out_specs=pl.BlockSpec((tile, cemb), lambda i: (i, 0)),
        compiler_params=pltpu.CompilerParams(dimension_semantics=("parallel",)),
    )(*args)


# ---------------------------------------------------------------------------
# HIGnnInterface (hetero MP_GNN, flavour='conv', n_heads=1) — JAX glue
# ---------------------------------------------------------------------------

METADATA = (
    ['image_node', 'class_node'],
    [('class_node', 'to', 'image_node'),
     ('image_node', 'self', 'image_node'),
     ('image_node', 'to', 'class_node')],
)


def heterogenous_mp_scaling(edge_types):
    count = {}
    for _, _, d in edge_types:
        count[d] = count.get(d, 0) + 1.0
    return {d: 1.0 / np.sqrt(v) for d, v in count.items()}


def _build_graph_structure(graph, num_nodes, edge_types, mp_scaling):
    """Dense normalized adjacency + folded residual gate per edge type (scatter is glue).

    adj[d, s]  = sum over parallel edges of deg(d)^-1/2 * (1/sqrt(2)) * mp_scaling[dst]
    gate[d]    = where(deg(d) > 0, 1/sqrt(2), 1.0) * mp_scaling[dst]
    so that  scaling * where(deg>0, mp_sum(res, neigh, 0.5), res) == res*gate + adj@...@Wn^T
    (neigh is exactly 0 for isolated destinations).
    """
    adj, gate = {}, {}
    for et in edge_types:
        s, _, d = et
        row, col = graph['edge_index'][et]
        ns, nd = num_nodes[s], num_nodes[d]
        scale = np.float32(mp_scaling[d])
        deg = jnp.zeros((nd,), jnp.float32).at[col].add(1.0)
        deg_inv = jnp.where(deg > 0, lax.rsqrt(jnp.maximum(deg, 1.0)), 0.0)
        a = jnp.zeros((nd, ns), jnp.float32).at[col, row].add(deg_inv[col])
        adj[et] = a * (INV_SQRT2 * scale)
        gate[et] = (jnp.where(deg > 0, INV_SQRT2, np.float32(1.0)) * scale).reshape(nd, 1)
    return adj, gate


def init_params(key, c_img, c_cls, cemb, gnn_channels, metadata, num_gnn_layers=2):
    node_types, edge_types = metadata
    in_ch = {'image_node': c_img, 'class_node': c_cls}
    n_keys = 2 * len(node_types) + 2 * num_gnn_layers * len(edge_types)
    keys = iter(jax.random.split(key, n_keys))
    params = {
        'lin_in': {nt: jax.random.normal(next(keys), (cemb, in_ch[nt]), jnp.float32)
                   for nt in node_types},
        'convs': [],
        'lin_out': {nt: jax.random.normal(next(keys), (gnn_channels, cemb), jnp.float32)
                    for nt in node_types},
        'cond_gain': jnp.ones((), jnp.float32),
    }
    for _ in range(num_gnn_layers):
        layer = {et: {'w_neigh': jax.random.normal(next(keys), (cemb, cemb), jnp.float32),
                      'w_res': jax.random.normal(next(keys), (cemb, cemb), jnp.float32)}
                 for et in edge_types}
        params['convs'].append(layer)
    return params


def hignn_forward(x_nchw, graph, params, metadata=METADATA):
    node_types, edge_types = metadata
    b, c, h, w = x_nchw.shape
    assert x_nchw.shape[0] == graph['image'].shape[0], 'Batch size mismatch'

    # (glue) NCHW -> node-major (B*H*W, C); normalize(x, dim=1) is fused into lin_in below.
    x_img = jnp.transpose(x_nchw, (0, 2, 3, 1)).reshape(-1, c)
    feats = {'image_node': x_img, 'class_node': graph['x']['class_node']}
    num_nodes = {nt: feats[nt].shape[0] for nt in node_types}

    mp_scaling = heterogenous_mp_scaling(edge_types)
    adj, gate = _build_graph_structure(graph, num_nodes, edge_types, mp_scaling)

    edges_by_dst = {}
    for et in edge_types:
        edges_by_dst.setdefault(et[2], []).append(et)
    assert set(edges_by_dst) == set(node_types), 'every node type must receive messages'

    # lin_in (per node type); image nodes get the fused row-normalization.
    hid = {
        'image_node': geolinear(feats['image_node'], params['lin_in']['image_node'],
                                normalize_in=True),
        'class_node': geolinear(feats['class_node'], params['lin_in']['class_node']),
    }

    # GNN layers: one fused kernel per destination node type per layer
    # (mp_silu -> HIPConv per edge type -> hetero sum -> mp_scaling).
    for layer in params['convs']:
        new_hid = {}
        for d, ets in edges_by_dst.items():
            edge_inputs = [(adj[et], hid[et[0]], layer[et]['w_neigh'],
                            layer[et]['w_res'], gate[et]) for et in ets]
            new_hid[d] = fused_hip_layer(hid[d], edge_inputs)
        hid = new_hid

    # lin_out (lane-dense padded cout); image variant fuses cond_gain and emits both
    # the un-gained graph embedding and the gained image-node output.
    gnn_channels = params['lin_out']['image_node'].shape[0]
    y_img_pad, out_img_pad = lin_out_with_gain(hid['image_node'],
                                               params['lin_out']['image_node'],
                                               params['cond_gain'])
    y_cls_pad = geolinear(hid['class_node'], params['lin_out']['class_node'], lane_pad=True)
    y = {'image_node': y_img_pad[:, :gnn_channels],
         'class_node': y_cls_pad[:, :params['lin_out']['class_node'].shape[0]]}

    out = out_img_pad[:, :gnn_channels].reshape(b, h, w, gnn_channels).transpose(0, 3, 1, 2)
    graph_out = dict(graph)
    graph_out['x'] = y
    # TODO(synk): training-time dropout and in-place forced weight re-normalization
    # (self.weight.copy_) are training-only and omitted (eval mode).
    return out, graph_out


# ---------------------------------------------------------------------------
# Example run
# ---------------------------------------------------------------------------

if __name__ == '__main__':
    B, C, H, W = 2, 8, 16, 16          # image input (NCHW)
    C_CLS = 16                         # raw class-node embedding dim
    CEMB = 128                         # gnn hidden channels (lane-dense: one full lane group)
    GNN_CHANNELS = 8                   # gnn output channels
    N_IMG = B * H * W                  # 512 image nodes
    N_CLS = 8

    key = jax.random.PRNGKey(0)
    k_x, k_cls, k_par = jax.random.split(key, 3)

    x = jax.random.normal(k_x, (B, C, H, W), jnp.float32)
    cls_feat = jax.random.normal(k_cls, (N_CLS, C_CLS), jnp.float32)

    # deterministic edge structure
    e1_dst = jnp.arange(384, dtype=jnp.int32)                # class -> image (nodes 384..511 isolated)
    e1_src = e1_dst % N_CLS
    e2_src = jnp.arange(0, N_IMG, 2, dtype=jnp.int32)        # image -> image (odd nodes receive)
    e2_dst = e2_src + 1
    e3_src = (jnp.arange(40, dtype=jnp.int32) * 7) % N_IMG   # image -> class
    e3_dst = jnp.arange(40, dtype=jnp.int32) % N_CLS

    graph = {
        'image': x,
        'x': {
            'image_node': jnp.zeros((N_IMG, C), jnp.float32),  # overwritten by forward
            'class_node': cls_feat,
        },
        'edge_index': {
            ('class_node', 'to', 'image_node'): (e1_src, e1_dst),
            ('image_node', 'self', 'image_node'): (e2_src, e2_dst),
            ('image_node', 'to', 'class_node'): (e3_src, e3_dst),
        },
    }

    params = init_params(k_par, C, C_CLS, CEMB, GNN_CHANNELS, METADATA, num_gnn_layers=2)

    out, graph_out = hignn_forward(x, graph, params, METADATA)
    out = jax.block_until_ready(out)
    jax.block_until_ready(graph_out['x']['class_node'])

    assert out.shape == (B, GNN_CHANNELS, H, W)
    assert graph_out['x']['image_node'].shape == (N_IMG, GNN_CHANNELS)
    assert graph_out['x']['class_node'].shape == (N_CLS, GNN_CHANNELS)
    assert bool(jnp.all(jnp.isfinite(out)))
    print("KERNEL_OK")
</pallas_src>

<mosaic_0001>
module attributes {stable_mosaic.version = 11 : i64} {
  func.func @_geolinear_kernel(%arg0: i32, %arg1: memref<256x8xf32, #tpu.memory_space<vmem>>, %arg2: memref<128x8xf32, #tpu.memory_space<vmem>>, %arg3: memref<256x128xf32, #tpu.memory_space<vmem>>) attributes {dimension_semantics = [#tpu.dimension_semantics<parallel>], iteration_bounds = array<i64: 2>, scalar_prefetch = 0 : i64, scratch_operands = 0 : i64, tpu.core_type = #tpu.core_type<tc>, window_params = [{transform_indices = @transform_0, window_bounds = array<i64: 256, 8>}, {pipeline_mode = #tpu.pipeline_mode<synchronous>, transform_indices = @transform_1, window_bounds = array<i64: 128, 8>}, {transform_indices = @transform_2, window_bounds = array<i64: 256, 128>}]} {
    %c0 = arith.constant 0 : index
    %c0_0 = arith.constant 0 : index
    %0 = vector.load %arg1[%c0, %c0_0] : memref<256x8xf32, #tpu.memory_space<vmem>>, vector<256x8xf32>
    %1 = arith.mulf %0, %0 : vector<256x8xf32>
    %cst = arith.constant dense<0.000000e+00> : vector<256xf32>
    %2 = vector.multi_reduction <add>, %1, %cst [1] : vector<256x8xf32> to vector<256xf32>
    %3 = vector.shape_cast %2 : vector<256xf32> to vector<256x1xf32>
    %4 = math.sqrt %3 : vector<256x1xf32>
    %cst_1 = arith.constant 0.353553385 : f32
    %5 = vector.broadcast %cst_1 : f32 to vector<256x1xf32>
    %6 = arith.mulf %4, %5 : vector<256x1xf32>
    %cst_2 = arith.constant 9.99999974E-5 : f32
    %7 = vector.broadcast %cst_2 : f32 to vector<256x1xf32>
    %8 = arith.addf %7, %6 : vector<256x1xf32>
    %9 = vector.broadcast %8 : vector<256x1xf32> to vector<256x8xf32>
    %10 = arith.divf %0, %9 : vector<256x8xf32>
    %c0_3 = arith.constant 0 : index
    %c0_4 = arith.constant 0 : index
    %11 = vector.load %arg2[%c0_3, %c0_4] : memref<128x8xf32, #tpu.memory_space<vmem>>, vector<128x8xf32>
    %12 = arith.mulf %11, %11 : vector<128x8xf32>
    %cst_5 = arith.constant dense<0.000000e+00> : vector<128xf32>
    %13 = vector.multi_reduction <add>, %12, %cst_5 [1] : vector<128x8xf32> to vector<128xf32>
    %14 = vector.shape_cast %13 : vector<128xf32> to vector<128x1xf32>
    %15 = math.sqrt %14 : vector<128x1xf32>
    %cst_6 = arith.constant 0.353553385 : f32
    %16 = vector.broadcast %cst_6 : f32 to vector<128x1xf32>
    %17 = arith.mulf %15, %16 : vector<128x1xf32>
    %cst_7 = arith.constant 9.99999974E-5 : f32
    %18 = vector.broadcast %cst_7 : f32 to vector<128x1xf32>
    %19 = arith.addf %18, %17 : vector<128x1xf32>
    %20 = vector.broadcast %19 : vector<128x1xf32> to vector<128x8xf32>
    %21 = arith.divf %11, %20 : vector<128x8xf32>
    %cst_8 = arith.constant 0.353553385 : f32
    %22 = vector.broadcast %cst_8 : f32 to vector<128x8xf32>
    %23 = arith.mulf %21, %22 : vector<128x8xf32>
    %cst_9 = arith.constant dense<0.000000e+00> : vector<256x128xf32>
    %24 = tpu.matmul %10, %23, %cst_9 {dimension_numbers = #tpu.dot_dimension_numbers<[1], [1], [0], [0], [0, 0, 1, 0], [], []>} : vector<256x8xf32>, vector<128x8xf32>, vector<256x128xf32> -> vector<256x128xf32>
    %c0_10 = arith.constant 0 : index
    %c0_11 = arith.constant 0 : index
    %25 = vector.load %arg3[%c0_10, %c0_11] : memref<256x128xf32, #tpu.memory_space<vmem>>, vector<256x128xf32>
    tpu.vector_store %arg3[%c0_10, %c0_11], %24 {strides = array<i32>} : memref<256x128xf32, #tpu.memory_space<vmem>>, vector<256x128xf32>,
    return
  }
  func.func @transform_0(%arg0: i32) -> (i32, i32) {
    %c0_i32 = arith.constant 0 : i32
    %c0_i32_0 = arith.constant 0 : i32
    return %arg0, %c0_i32 : i32, i32
  }
  func.func @transform_1(%arg0: i32) -> (i32, i32) {
    %c0_i32 = arith.constant 0 : i32
    %c0_i32_0 = arith.constant 0 : i32
    %c0_i32_1 = arith.constant 0 : i32
    return %c0_i32, %c0_i32_0 : i32, i32
  }
  func.func @transform_2(%arg0: i32) -> (i32, i32) {
    %c0_i32 = arith.constant 0 : i32
    %c0_i32_0 = arith.constant 0 : i32
    return %arg0, %c0_i32 : i32, i32
  }
}

</mosaic_0001>

<bundles_post_ra>
// kernel: tpu_custom_call.1
= control target key start
LH: loop header
LB: loop body
LE: loop exit
PB: predicated region body
PF: predicated region fallthrough
CT: control target
= control target key end

     0   :  { %7 = vsyncpa [#allocation3], 0  ;;  %s3081_s0 = inlined_call_operand.vmem [shape: f32[512,8], index: 0, kind: input, shape index: {}]   ;;  %s3082_s1 = inlined_call_operand.vmem [shape: f32[128,8], index: 1, kind: input, shape index: {}]   ;;  %s3083_s2 = inlined_call_operand.hbm [shape: f32[512,128], index: 2, kind: output, shape index: {}]  }
   0x1   :  { %9 = vsyncpa [#allocation3 + $0x1], 0  ;;  %s1985_s9 = smov 0   ;;  %s1987_s10 = smov 0  }
   0x2   :  { %s1989_s11 = smov 0   ;;  %s1991_s12 = smov 0  }
   0x3 LB: > { %s2006_s13 = sadd.s32 4294967295, %s1965_s12   ;;  %s1407_s14 = sadd.s32 4294967294, %s1965_s12   ;;  %s1965_s12 = sphi %s1991_s12, %s3089_s12   ;;  %s1961_s11 = sphi %s1989_s11, %s3088_s11   ;;  %s1957_s10 = sphi %s1987_s10, %s3087_s10   ;;  %s1953_s9 = sphi %s1985_s9, %s3086_s9  }
   0x4   : > { %s2010_s15 = sadd.s32 1, %s1965_s12   ;;  %s69_s16 = sadd.s32 1, %s1961_s11 }
   0x5   : > { %s66_s17 = ssub.s32 %s1965_s12, %s2010_s15  ;;  %p79_p0 = scmp.ne.s32.totalorder %s1961_s11, %s1957_s10 }
   0x6   : > { %p67_p1 = scmp.eq.s32.totalorder %s66_s17, 0  ;;  %p80_p2 = scmp.eq.s32.totalorder %s2006_s13, 1 }
   0x7   : > { %p85_p3 = scmp.ne.s32.totalorder %s1957_s10, %s1953_s9  ;;  %p86_p4 = scmp.eq.s32.totalorder %s1407_s14, 1 }
   0x8   : > { %s2021_s18 = scalar_select %p67_p1, %s1961_s11, %s69_s16  }
   0x9   : > { %p2023_p5 = por %p80_p2, %p79_p0  ;;  %p2027_p6 = por %p86_p4, %p85_p3 }
   0xa   : > { %p1410_p7 = scmp.ge.s32.totalorder %s1965_s12, 1  ;;  %p116_p8 = scmp.lt.s32.totalorder %s1965_s12, 3 }
   0xc   : > { %p117_p9 = pnand %p1410_p7, %p116_p8 }
   0xd   : > { %s1412_s14 = sshll.u32 (!%p117_p9), %s2006_s13, 5  ;;  %s135_s26 = sand.u32 (!%p117_p9), 1, %s1957_s10  }
   0xe   : > { %120 = sbr.rel (%p117_p9) target bundleno = 533 (0x215), region = 28  ;;  %p139_p10 = scmp.lt.s32.totalorder (!%p117_p9), %s1412_s14, 63 }
   0xf   : > { %s1411_s27 = sshll.u32 (!%p117_p9), %s135_s26, 8  ;;  %s1967_s6 = smov (!%p117_p9), [#allocation2]  }
  0x10   : > { %s2996_s28 = scalar_lea.vmem (!%p117_p9), [#allocation2], %s1411_s27  ;;  %s1909_s7 = sshll.u32 (!%p117_p9), %s1967_s6, 4  ;;  %s1910_s7 = int_to_ptr.vmem [resolvable:$false] %s1909_s7 }
  0x11   : > { %s1345_s29 = sshll.u32 (!%p117_p9), %s2996_s28, 4  ;;  %s1911_s8 = scalar_lea.vmem (!%p117_p9), %s1910_s7, 8192  ;;  %s3033_s29 = int_to_ptr.vmem [resolvable:$true] %s1345_s29 }
  0x12   : > { %s1905_s5 = scalar_lea.vmem (!%p117_p9), %s3033_s29, 4096  ;;  %p1912_p0 = scmp.lt.s32.totalorder (!%p117_p9), %s3033_s29, %s1910_s7 }
  0x13   : > { %vm209_vm0 = vcmask 64512   ;;  %v2036_v0 = vld [vmem:[%s3082_s1 + $0x78] sm:$0xff]  ;;  %v2041_v1 = vld [vmem:[%s3082_s1 + $0x68] sm:$0xff]  ;;  %v2046_v2 = vld [vmem:[%s3082_s1 + $0x70] sm:$0xff]  ;;  %s3091_s14 = smov (!%p139_p10, %s1412_s14), 63  ;;  %p1906_p11 = scmp.ne.s32.totalorder %s3033_s29, %s1905_s5 }
  0x14   : > { %v689_v3 = vmul.f32 %v2036_v0, %v2036_v0  ;;  %v687_v4 = vmul.f32 %v2041_v1, %v2041_v1  ;;  %v688_v5 = vmul.f32 %v2046_v2, %v2046_v2  ;;  %v2057_v6 = vld [vmem:[%s3082_s1 + $0x60] sm:$0xff]  ;;  %v669_v8 = vld [vmem:[%s3082_s1 + $0x58] sm:$0xff]  ;;  %v668_v9 = vld [vmem:[%s3082_s1 + $0x50] sm:$0xff]  ;;  %s1413_s3 = sshll.u32 %s3091_s14, 3  ;;  %p1913_p1 = scmp.lt.s32.totalorder %s1911_s8, %s1905_s5 }
  0x15   : > { %v686_v7 = vmul.f32 %v2057_v6, %v2057_v6  ;;  %v685_v14 = vmul.f32 %v669_v8, %v669_v8  ;;  %v684_v15 = vmul.f32 %v668_v9, %v668_v9  ;;  %v667_v16 = vld [vmem:[%s3082_s1 + $0x48] sm:$0xff]  ;;  %v666_v17 = vld [vmem:[%s3082_s1 + $0x40] sm:$0xff]  ;;  %v665_v22 = vld [vmem:[%s3082_s1 + $0x38] sm:$0xff]  ;;  %s2113_s17 = scalar_lea.vmem %s3081_s0, %s1413_s3  ;;  %p1907_p12 = pnand %p1906_p11, %p2023_p5 }
  0x16   : > { %v735_v10 = vsel %vm209_vm0, %v689_v3, 0.0  ;;  %v729_v11 = vsel %vm209_vm0, %v687_v4, 0.0  ;;  %v732_v12 = vsel %vm209_vm0, %v688_v5, 0.0  ;;  %v683_v20 = vmul.f32 %v667_v16, %v667_v16  ;;  %v664_v23 = vld [vmem:[%s3082_s1 + $0x30] sm:$0xff]  ;;  %v663_v28 = vld [vmem:[%s3082_s1 + $0x28] sm:$0xff]  ;;  %v662_v29 = vld [vmem:[%s3082_s1 + $0x20] sm:$0xff]  ;;  %p1914_p2 = por %p1913_p1, %p1912_p0 }
  0x17   : > { %736 = vadd.xlane.f32.xlu0 %v735_v10  ;;  %730 = vadd.xlane.f32.xlu1 %v729_v11  ;;  %v726_v13 = vsel %vm209_vm0, %v686_v7, 0.0  ;;  %v723_v18 = vsel %vm209_vm0, %v685_v14, 0.0  ;;  %v720_v19 = vsel %vm209_vm0, %v684_v15, 0.0  ;;  %v682_v21 = vmul.f32 %v666_v17, %v666_v17  ;;  %v661_v34 = vld [vmem:[%s3082_s1 + $0x18] sm:$0xff]  ;;  %v660_v35 = vld [vmem:[%s3082_s1 + $0x10] sm:$0xff]  ;;  %v659_v40 = vld [vmem:[%s3082_s1 + $0x8] sm:$0xff]  ;;  %p1908_p13 = pneg %p1907_p12 }
  0x18   : > { %v717_v24 = vsel %vm209_vm0, %v683_v20, 0.0  ;;  %v681_v26 = vmul.f32 %v665_v22, %v665_v22  ;;  %v680_v27 = vmul.f32 %v664_v23, %v664_v23  ;;  %v679_v32 = vmul.f32 %v663_v28, %v663_v28  ;;  %v658_v41 = vld [vmem:[%s3082_s1] sm:$0xff]  ;;  %v162_v52 = vld [vmem:[%s2113_s17 + $0x88] sm:$0xff]  ;;  %v163_v58 = vld [vmem:[%s2113_s17 + $0x90] sm:$0xff] }
  0x19   : > { %v714_v25 = vsel %vm209_vm0, %v682_v21, 0.0  ;;  %v678_v33 = vmul.f32 %v662_v29, %v662_v29  ;;  %v677_v38 = vmul.f32 %v661_v34, %v661_v34  ;;  %v676_v39 = vmul.f32 %v660_v35, %v660_v35  ;;  %v161_v46 = vld [vmem:[%s2113_s17 + $0x80] sm:$0xff]  ;;  %v146_v53 = vld [vmem:[%s2113_s17 + $0x8] sm:$0xff]  ;;  %v147_v59 = vld [vmem:[%s2113_s17 + $0x10] sm:$0xff]  ;;  %p1915_p3 = pnand %p1914_p2, %p1908_p13 }
  0x1a   : > { %v711_v30 = vsel %vm209_vm0, %v681_v26, 0.0  ;;  %v708_v31 = vsel %vm209_vm0, %v680_v27, 0.0  ;;  %v705_v36 = vsel %vm209_vm0, %v679_v32, 0.0  ;;  %v675_v44 = vmul.f32 %v659_v40, %v659_v40  ;;  %v145_v47 = vld [vmem:[%s2113_s17] sm:$0xff]  ;;  %v164_v3 = vld [vmem:[%s2113_s17 + $0x98] sm:$0xff]  ;;  %v166_v16 = vld [vmem:[%s2113_s17 + $0xa8] sm:$0xff] }
  0x1b   : > { %733 = vadd.xlane.f32.xlu0 %v732_v12  ;;  %727 = vadd.xlane.f32.xlu1 %v726_v13  ;;  %v702_v37 = vsel %vm209_vm0, %v678_v33, 0.0  ;;  %v699_v42 = vsel %vm209_vm0, %v677_v38, 0.0  ;;  %v696_v43 = vsel %vm209_vm0, %v676_v39, 0.0  ;;  %v674_v45 = vmul.f32 %v658_v41, %v658_v41  ;;  %v148_v4 = vld [vmem:[%s2113_s17 + $0x18] sm:$0xff]  ;;  %v165_v10 = vld [vmem:[%s2113_s17 + $0xa0] sm:$0xff]  ;;  %v150_v17 = vld [vmem:[%s2113_s17 + $0x28] sm:$0xff] }
  0x1c   : > { %v693_v48 = vsel %vm209_vm0, %v675_v44, 0.0  ;;  %v193_v50 = vmul.f32 %v161_v46, %v161_v46  ;;  %v177_v51 = vmul.f32 %v145_v47, %v145_v47  ;;  %v194_v56 = vmul.f32 %v162_v52, %v162_v52  ;;  %v149_v11 = vld [vmem:[%s2113_s17 + $0x20] sm:$0xff]  ;;  %v167_v22 = vld [vmem:[%s2113_s17 + $0xb0] sm:$0xff]  ;;  %v168_v28 = vld [vmem:[%s2113_s17 + $0xb8] sm:$0xff] }
  0x1d   : > { %v690_v49 = vsel %vm209_vm0, %v674_v45, 0.0  ;;  %v178_v57 = vmul.f32 %v146_v53, %v146_v53  ;;  %v195_v62 = vmul.f32 %v163_v58, %v163_v58  ;;  %v179_v63 = vmul.f32 %v147_v59, %v147_v59  ;;  %v151_v23 = vld [vmem:[%s2113_s17 + $0x30] sm:$0xff]  ;;  %v152_v29 = vld [vmem:[%s2113_s17 + $0x38] sm:$0xff]  ;;  %v169_v34 = vld [vmem:[%s2113_s17 + $0xc0] sm:$0xff] }
  0x1e   : > { %v258_v54 = vsel %vm209_vm0, %v193_v50, 0.0  ;;  %v210_v55 = vsel %vm209_vm0, %v177_v51, 0.0  ;;  %v261_v60 = vsel %vm209_vm0, %v194_v56, 0.0  ;;  %v196_v8 = vmul.f32 %v164_v3, %v164_v3  ;;  %v153_v35 = vld [vmem:[%s2113_s17 + $0x40] sm:$0xff]  ;;  %v170_v40 = vld [vmem:[%s2113_s17 + $0xc8] sm:$0xff]  ;;  %v171_v46 = vld [vmem:[%s2113_s17 + $0xd0] sm:$0xff] }
  0x1f   : > { %724 = vadd.xlane.f32.xlu0 %v723_v18  ;;  %721 = vadd.xlane.f32.xlu1 %v720_v19  ;;  %v213_v61 = vsel %vm209_vm0, %v178_v57, 0.0  ;;  %v264_v5 = vsel %vm209_vm0, %v195_v62, 0.0  ;;  %v216_v7 = vsel %vm209_vm0, %v179_v63, 0.0  ;;  %v180_v9 = vmul.f32 %v148_v4, %v148_v4  ;;  %v154_v41 = vld [vmem:[%s2113_s17 + $0x48] sm:$0xff]  ;;  %v155_v47 = vld [vmem:[%s2113_s17 + $0x50] sm:$0xff]  ;;  %v172_v52 = vld [vmem:[%s2113_s17 + $0xd8] sm:$0xff] }
  0x20   : > { %v267_v12 = vsel %vm209_vm0, %v196_v8, 0.0  ;;  %v197_v14 = vmul.f32 %v165_v10, %v165_v10  ;;  %v181_v15 = vmul.f32 %v149_v11, %v149_v11  ;;  %v198_v20 = vmul.f32 %v166_v16, %v166_v16  ;;  %v156_v53 = vld [vmem:[%s2113_s17 + $0x58] sm:$0xff]  ;;  %v173_v58 = vld [vmem:[%s2113_s17 + $0xe0] sm:$0xff]  ;;  %v174_v3 = vld [vmem:[%s2113_s17 + $0xe8] sm:$0xff] }
  0x21   : > { %v219_v13 = vsel %vm209_vm0, %v180_v9, 0.0  ;;  %v182_v21 = vmul.f32 %v150_v17, %v150_v17  ;;  %v199_v26 = vmul.f32 %v167_v22, %v167_v22  ;;  %v183_v27 = vmul.f32 %v151_v23, %v151_v23  ;;  %v157_v59 = vld [vmem:[%s2113_s17 + $0x60] sm:$0xff]  ;;  %v158_v4 = vld [vmem:[%s2113_s17 + $0x68] sm:$0xff]  ;;  %v175_v10 = vld [vmem:[%s2113_s17 + $0xf0] sm:$0xff] }
  0x22   : > { %v270_v18 = vsel %vm209_vm0, %v197_v14, 0.0  ;;  %v222_v19 = vsel %vm209_vm0, %v181_v15, 0.0  ;;  %v200_v32 = vmul.f32 %v168_v28, %v168_v28  ;;  %v184_v33 = vmul.f32 %v152_v29, %v152_v29  ;;  %v159_v11 = vld [vmem:[%s2113_s17 + $0x70] sm:$0xff]  ;;  %v176_v16 = vld [vmem:[%s2113_s17 + $0xf8] sm:$0xff] }
  0x23   : > { %718 = vadd.xlane.f32.xlu0 %v717_v24  ;;  %715 = vadd.xlane.f32.xlu1 %v714_v25  ;;  %v273_v24 = vsel %vm209_vm0, %v198_v20, 0.0  ;;  %v225_v25 = vsel %vm209_vm0, %v182_v21, 0.0  ;;  %v201_v38 = vmul.f32 %v169_v34, %v169_v34  ;;  %v185_v39 = vmul.f32 %v153_v35, %v153_v35  ;;  %v160_v17 = vld [vmem:[%s2113_s17 + $0x78] sm:$0xff] }
  0x24   : > { %v202_v44 = vmul.f32 %v170_v40, %v170_v40  ;;  %v186_v45 = vmul.f32 %v154_v41, %v154_v41  ;;  %v203_v50 = vmul.f32 %v171_v46, %v171_v46  ;;  %v187_v51 = vmul.f32 %v155_v47, %v155_v47 }
  0x25   : > { %v204_v56 = vmul.f32 %v172_v52, %v172_v52  ;;  %v188_v57 = vmul.f32 %v156_v53, %v156_v53  ;;  %v205_v62 = vmul.f32 %v173_v58, %v173_v58  ;;  %v189_v63 = vmul.f32 %v157_v59, %v157_v59 }
  0x26   : > { %v206_v8 = vmul.f32 %v174_v3, %v174_v3  ;;  %v190_v9 = vmul.f32 %v158_v4, %v158_v4  ;;  %v207_v14 = vmul.f32 %v175_v10, %v175_v10  ;;  %v191_v15 = vmul.f32 %v159_v11, %v159_v11 }
  0x27   : > { %712 = vadd.xlane.f32.xlu0 %v711_v30  ;;  %709 = vadd.xlane.f32.xlu1 %v708_v31  ;;  %v276_v30 = vsel %vm209_vm0, %v199_v26, 0.0  ;;  %v228_v31 = vsel %vm209_vm0, %v183_v27, 0.0  ;;  %v208_v20 = vmul.f32 %v176_v16, %v176_v16  ;;  %v192_v21 = vmul.f32 %v160_v17, %v160_v17 }
  0x29   : > { %v303_v22 = vsel %vm209_vm0, %v208_v20, 0.0  ;;  %v255_v23 = vsel %vm209_vm0, %v192_v21, 0.0 }
  0x2b   : > { %706 = vadd.xlane.f32.xlu0 %v705_v36  ;;  %703 = vadd.xlane.f32.xlu1 %v702_v37  ;;  %v279_v36 = vsel %vm209_vm0, %v200_v32, 0.0  ;;  %v231_v37 = vsel %vm209_vm0, %v184_v33, 0.0 }
  0x2f   : > { %700 = vadd.xlane.f32.xlu0 %v699_v42  ;;  %697 = vadd.xlane.f32.xlu1 %v696_v43  ;;  %v282_v42 = vsel %vm209_vm0, %v201_v38, 0.0  ;;  %v234_v43 = vsel %vm209_vm0, %v185_v39, 0.0 }
  0x33   : > { %694 = vadd.xlane.f32.xlu0 %v693_v48  ;;  %691 = vadd.xlane.f32.xlu1 %v690_v49  ;;  %v285_v48 = vsel %vm209_vm0, %v202_v44, 0.0  ;;  %v237_v49 = vsel %vm209_vm0, %v186_v45, 0.0 }
  0x37   : > { %259 = vadd.xlane.f32.xlu1 %v258_v54  ;;  %211 = vadd.xlane.f32.xlu0 %v210_v55  ;;  %v288_v54 = vsel %vm209_vm0, %v203_v50, 0.0  ;;  %v240_v55 = vsel %vm209_vm0, %v187_v51, 0.0 }
  0x3b   : > { %262 = vadd.xlane.f32.xlu1 %v261_v60  ;;  %214 = vadd.xlane.f32.xlu0 %v213_v61  ;;  %v291_v60 = vsel %vm209_vm0, %v204_v56, 0.0  ;;  %v243_v61 = vsel %vm209_vm0, %v188_v57, 0.0 }
  0x3f   : > { %265 = vadd.xlane.f32.xlu1 %v264_v5  ;;  %217 = vadd.xlane.f32.xlu0 %v216_v7  ;;  %v294_v5 = vsel %vm209_vm0, %v205_v62, 0.0  ;;  %v246_v7 = vsel %vm209_vm0, %v189_v63, 0.0 }
  0x43   : > { %268 = vadd.xlane.f32.xlu1 %v267_v12  ;;  %220 = vadd.xlane.f32.xlu0 %v219_v13  ;;  %v297_v12 = vsel %vm209_vm0, %v206_v8, 0.0  ;;  %v249_v13 = vsel %vm209_vm0, %v190_v9, 0.0 }
  0x47   : > { %271 = vadd.xlane.f32.xlu1 %v270_v18  ;;  %223 = vadd.xlane.f32.xlu0 %v222_v19  ;;  %v300_v18 = vsel %vm209_vm0, %v207_v14, 0.0  ;;  %v252_v19 = vsel %vm209_vm0, %v191_v15, 0.0 }
  0x4b   : > { %274 = vadd.xlane.f32.xlu1 %v273_v24  ;;  %226 = vadd.xlane.f32.xlu0 %v225_v25 }
  0x4f   : > { %277 = vadd.xlane.f32.xlu1 %v276_v30  ;;  %229 = vadd.xlane.f32.xlu0 %v228_v31 }
  0x53   : > { %280 = vadd.xlane.f32.xlu1 %v279_v36  ;;  %232 = vadd.xlane.f32.xlu0 %v231_v37 }
  0x57   : > { %283 = vadd.xlane.f32.xlu1 %v282_v42  ;;  %235 = vadd.xlane.f32.xlu0 %v234_v43 }
  0x5b   : > { %286 = vadd.xlane.f32.xlu1 %v285_v48  ;;  %238 = vadd.xlane.f32.xlu0 %v237_v49 }
  0x5f   : > { %289 = vadd.xlane.f32.xlu1 %v288_v54  ;;  %241 = vadd.xlane.f32.xlu0 %v240_v55 }
  0x63   : > { %292 = vadd.xlane.f32.xlu1 %v291_v60  ;;  %244 = vadd.xlane.f32.xlu0 %v243_v61 }
  0x67   : > { %295 = vadd.xlane.f32.xlu1 %v294_v5  ;;  %247 = vadd.xlane.f32.xlu0 %v246_v7 }
  0x6b   : > { %298 = vadd.xlane.f32.xlu1 %v297_v12  ;;  %250 = vadd.xlane.f32.xlu0 %v249_v13 }
  0x6f   : > { %301 = vadd.xlane.f32.xlu1 %v300_v18  ;;  %253 = vadd.xlane.f32.xlu0 %v252_v19 }
  0x73   : > { %304 = vadd.xlane.f32.xlu1 %v303_v22  ;;  %256 = vadd.xlane.f32.xlu0 %v255_v23 }
  0xa0   : > { %v737_v24 = vpop.xlane.xlu0 %736  ;;  %v731_v25 = vpop.xlane.xlu1 %730 }
  0xa1   : > { %1669 = vrsqrt.f32 %v737_v24  ;;  %vm845_vm1 = vcmp.eq.f32.partialorder %v737_v24, inf  ;;  %vm847_vm2 = vcmp.eq.f32.partialorder %v737_v24, 0.0  ;;  %v848_v33 = vand.u32 2147483648, %v737_v24 }
  0xa2   : > { %1671 = vrsqrt.f32 %v731_v25  ;;  %vm831_vm3 = vcmp.eq.f32.partialorder %v731_v25, inf  ;;  %vm833_vm4 = vcmp.eq.f32.partialorder %v731_v25, 0.0  ;;  %v834_v36 = vand.u32 2147483648, %v731_v25 }
  0xa4   : > { %v734_v26 = vpop.xlane.xlu0 %733  ;;  %v728_v27 = vpop.xlane.xlu1 %727 }
  0xa5   : > { %1673 = vrsqrt.f32 %v734_v26  ;;  %vm838_vm5 = vcmp.eq.f32.partialorder %v734_v26, inf  ;;  %vm840_vm6 = vcmp.eq.f32.partialorder %v734_v26, 0.0  ;;  %v841_v38 = vand.u32 2147483648, %v734_v26 }
  0xa6   : > { %1675 = vrsqrt.f32 %v728_v27  ;;  %vm824_vm7 = vcmp.eq.f32.partialorder %v728_v27, inf  ;;  %vm826_vm8 = vcmp.eq.f32.partialorder %v728_v27, 0.0  ;;  %v827_v42 = vand.u32 2147483648, %v728_v27 }
  0xa8   : > { %v2183_v28 = vpop.xlane.xlu0 %724  ;;  %v2185_v29 = vpop.xlane.xlu1 %721 }
  0xa9   : > { %1677 = vrsqrt.f32 %v2183_v28  ;;  %vm817_vm9 = vcmp.eq.f32.partialorder %v2183_v28, inf  ;;  %vm819_vm10 = vcmp.eq.f32.partialorder %v2183_v28, 0.0  ;;  %v820_v49 = vand.u32 2147483648, %v2183_v28 }
  0xaa   : > { %1679 = vrsqrt.f32 %v2185_v29  ;;  %vm810_vm11 = vcmp.eq.f32.partialorder %v2185_v29, inf  ;;  %vm812_vm12 = vcmp.eq.f32.partialorder %v2185_v29, 0.0  ;;  %v813_v55 = vand.u32 2147483648, %v2185_v29 }
  0xac   : > { %v2189_v30 = vpop.xlane.xlu0 %718  ;;  %v2191_v31 = vpop.xlane.xlu1 %715 }
  0xad   : > { %1681 = vrsqrt.f32 %v2189_v30  ;;  %vm803_vm13 = vcmp.eq.f32.partialorder %v2189_v30, inf  ;;  %vm805_vm14 = vcmp.eq.f32.partialorder %v2189_v30, 0.0  ;;  %v806_v3 = vand.u32 2147483648, %v2189_v30 }
  0xae   : > { %v1670_v32 = vpop.eup %1669  ;;  %1683 = vrsqrt.f32 %v2191_v31  ;;  %vm796_vm15 = vcmp.eq.f32.partialorder %v2191_v31, inf  ;;  %v799_v11 = vand.u32 2147483648, %v2191_v31 }
  0xaf   : > { %v1672_v34 = vpop.eup %1671  ;;  %v844_v35 = vmul.f32 %v1670_v32, %v737_v24 }
  0xb0   : > { %v830_v37 = vmul.f32 %v1672_v34, %v731_v25  ;;  %v2195_v39 = vpop.xlane.xlu0 %712  ;;  %v2197_v40 = vpop.xlane.xlu1 %709 }
  0xb1   : > { %v846_v41 = vsel %vm845_vm1, %v737_v24, %v844_v35  ;;  %1685 = vrsqrt.f32 %v2195_v39  ;;  %vm798_vm1 = vcmp.eq.f32.partialorder %v2191_v31, 0.0 }
  0xb2   : > { %v1674_v43 = vpop.eup %1673  ;;  %v849_v44 = vsel %vm847_vm2, %v848_v33, %v846_v41  ;;  %v832_v45 = vsel %vm831_vm3, %v731_v25, %v830_v37  ;;  %1687 = vrsqrt.f32 %v2197_v40  ;;  %vm789_vm2 = vcmp.eq.f32.partialorder %v2195_v39, inf }
  0xb3   : > { %v1676_v46 = vpop.eup %1675  ;;  %v835_v47 = vsel %vm833_vm4, %v834_v36, %v832_v45  ;;  %v837_v48 = vmul.f32 %v1674_v43, %v734_v26  ;;  %v865_v50 = vmul.f32 0.35355338, %v849_v44  ;;  %vm791_vm3 = vcmp.eq.f32.partialorder %v2195_v39, 0.0 }
  0xb4   : > { %v823_v51 = vmul.f32 %v1676_v46, %v728_v27  ;;  %v2210_v52 = vpop.xlane.xlu0 %706  ;;  %v2212_v53 = vpop.xlane.xlu1 %703  ;;  %v863_v57 = vmul.f32 0.35355338, %v835_v47  ;;  %vm782_vm4 = vcmp.eq.f32.partialorder %v2197_v40, inf }
  0xb5   : > { %v839_v54 = vsel %vm838_vm5, %v734_v26, %v837_v48  ;;  %1689 = vrsqrt.f32 %v2210_v52  ;;  %v881_v4 = vadd.f32 0.0001, %v865_v50  ;;  %vm784_vm5 = vcmp.eq.f32.partialorder %v2197_v40, 0.0 }
  0xb6   : > { %v1678_v56 = vpop.eup %1677  ;;  %v842_v58 = vsel %vm840_vm6, %v841_v38, %v839_v54  ;;  %v825_v59 = vsel %vm824_vm7, %v728_v27, %v823_v51  ;;  %1691 = vrsqrt.f32 %v2212_v53  ;;  %v879_v13 = vadd.f32 0.0001, %v863_v57 }
  0xb7   : > { %v1680_v60 = vpop.eup %1679  ;;  %v864_v61 = vmul.f32 0.35355338, %v842_v58  ;;  %v828_v62 = vsel %vm826_vm8, %v827_v42, %v825_v59  ;;  %v816_v63 = vmul.f32 %v1678_v56, %v2183_v28  ;;  %1693 = vrcp.f32 %v881_v4 }
  0xb8   : > { %v862_v5 = vmul.f32 0.35355338, %v828_v62  ;;  %v809_v7 = vmul.f32 %v1680_v60, %v2185_v29  ;;  %v2226_v8 = vpop.xlane.xlu0 %700  ;;  %v2228_v9 = vpop.xlane.xlu1 %697  ;;  %v792_v27 = vand.u32 2147483648, %v2195_v39  ;;  %vm775_vm6 = vcmp.eq.f32.partialorder %v2210_v52, inf }
  0xb9   : > { %v818_v10 = vsel %vm817_vm9, %v2183_v28, %v816_v63  ;;  %v880_v17 = vadd.f32 0.0001, %v864_v61  ;;  %1695 = vrsqrt.f32 %v2226_v8  ;;  %vm777_vm7 = vcmp.eq.f32.partialorder %v2210_v52, 0.0 }
  0xba   : > { %v1682_v12 = vpop.eup %1681  ;;  %v821_v14 = vsel %vm819_vm10, %v820_v49, %v818_v10  ;;  %v811_v15 = vsel %vm810_vm11, %v2185_v29, %v809_v7  ;;  %v878_v21 = vadd.f32 0.0001, %v862_v5  ;;  %1697 = vrcp.f32 %v879_v13 }
  0xbb   : > { %v1684_v16 = vpop.eup %1683  ;;  %v861_v18 = vmul.f32 0.35355338, %v821_v14  ;;  %v814_v19 = vsel %vm812_vm12, %v813_v55, %v811_v15  ;;  %v802_v20 = vmul.f32 %v1682_v12, %v2189_v30  ;;  %1699 = vrcp.f32 %v880_v17 }
  0xbc   : > { %v860_v22 = vmul.f32 0.35355338, %v814_v19  ;;  %v795_v23 = vmul.f32 %v1684_v16, %v2191_v31  ;;  %v2246_v24 = vpop.xlane.xlu0 %694  ;;  %v2248_v25 = vpop.xlane.xlu1 %691  ;;  %1701 = vrcp.f32 %v878_v21  ;;  %v778_v55 = vand.u32 2147483648, %v2210_v52 }
  0xbd   : > { %v804_v26 = vsel %vm803_vm13, %v2189_v30, %v802_v20  ;;  %v877_v29 = vadd.f32 0.0001, %v861_v18  ;;  %1703 = vrsqrt.f32 %v2228_v9  ;;  %vm768_vm8 = vcmp.eq.f32.partialorder %v2212_v53, inf }
  0xbe   : > { %v1686_v28 = vpop.eup %1685  ;;  %v807_v32 = vsel %vm805_vm14, %v806_v3, %v804_v26  ;;  %v797_v33 = vsel %vm796_vm15, %v2191_v31, %v795_v23  ;;  %v876_v38 = vadd.f32 0.0001, %v860_v22  ;;  %v785_v31 = vand.u32 2147483648, %v2197_v40 }
  0xbf   : > { %v1688_v34 = vpop.eup %1687  ;;  %v859_v35 = vmul.f32 0.35355338, %v807_v32  ;;  %v800_v36 = vsel %vm798_vm1, %v799_v11, %v797_v33  ;;  %v788_v37 = vmul.f32 %v1686_v28, %v2195_v39  ;;  %1705 = vrcp.f32 %v877_v29 }
  0xc0   : > { %v858_v41 = vmul.f32 0.35355338, %v800_v36  ;;  %v781_v42 = vmul.f32 %v1688_v34, %v2197_v40  ;;  %v2265_v43 = vpop.xlane.xlu1 %259  ;;  %v2267_v30 = vpop.xlane.xlu0 %211  ;;  %1707 = vrcp.f32 %v876_v38  ;;  %vm770_vm9 = vcmp.eq.f32.partialorder %v2212_v53, 0.0 }
  0xc1   : > { %v790_v44 = vsel %vm789_vm2, %v2195_v39, %v788_v37  ;;  %v875_v48 = vadd.f32 0.0001, %v859_v35  ;;  %1709 = vrsqrt.f32 %v2246_v24  ;;  %v771_v63 = vand.u32 2147483648, %v2212_v53 }
  0xc2   : > { %v1690_v45 = vpop.eup %1689  ;;  %v793_v46 = vsel %vm791_vm3, %v792_v27, %v790_v44  ;;  %v783_v47 = vsel %vm782_vm4, %v2197_v40, %v781_v42  ;;  %v874_v54 = vadd.f32 0.0001, %v858_v41  ;;  %1711 = vrsqrt.f32 %v2248_v25 }
  0xc3   : > { %v857_v49 = vmul.f32 0.35355338, %v793_v46  ;;  %v786_v50 = vsel %vm784_vm5, %v785_v31, %v783_v47  ;;  %v774_v51 = vmul.f32 %v1690_v45, %v2210_v52  ;;  %v1692_v40 = vpop.eup %1691  ;;  %1713 = vrcp.f32 %v875_v48 }
  0xc4   : > { %v2282_v56 = vpop.xlane.xlu1 %262  ;;  %v2284_v57 = vpop.xlane.xlu0 %214  ;;  %v856_v58 = vmul.f32 0.35355338, %v786_v50  ;;  %v767_v62 = vmul.f32 %v1692_v40, %v2212_v53  ;;  %1715 = vrcp.f32 %v874_v54  ;;  %vm761_vm10 = vcmp.eq.f32.partialorder %v2226_v8, inf }
  0xc5   : > { %v776_v39 = vsel %vm775_vm6, %v2210_v52, %v774_v51  ;;  %v873_v60 = vadd.f32 0.0001, %v857_v49  ;;  %v1694_v4 = vpop.eup %1693  ;;  %vm763_vm11 = vcmp.eq.f32.partialorder %v2226_v8, 0.0  ;;  %1717 = vrsqrt.f32 %v2265_v43 }
  0xc6   : > { %v779_v59 = vsel %vm777_vm7, %v778_v55, %v776_v39  ;;  %v769_v5 = vsel %vm768_vm8, %v2212_v53, %v767_v62  ;;  %v1696_v7 = vpop.eup %1695  ;;  %v872_v10 = vadd.f32 0.0001, %v856_v58  ;;  %v764_v11 = vand.u32 2147483648, %v2226_v8 }
  0xc7   : > { %v855_v61 = vmul.f32 0.35355338, %v779_v59  ;;  %vm754_vm12 = vcmp.eq.f32.partialorder %v2228_v9, inf  ;;  %1719 = vrsqrt.f32 %v2267_v30  ;;  %v2305_v12 = vpop.eup %1697  ;;  %v772_v14 = vsel %vm770_vm9, %v771_v63, %v769_v5 }
  0xc8   : > { %v2294_v52 = vpop.xlane.xlu1 %265  ;;  %v2296_v3 = vpop.xlane.xlu0 %217  ;;  %1721 = vrcp.f32 %v873_v60  ;;  %v760_v15 = vmul.f32 %v1696_v7, %v2226_v8  ;;  %vm756_vm13 = vcmp.eq.f32.partialorder %v2228_v9, 0.0  ;;  %v757_v17 = vand.u32 2147483648, %v2228_v9 }
  0xc9   : > { %v871_v13 = vadd.f32 0.0001, %v855_v61  ;;  %v2310_v16 = vpop.eup %1699  ;;  %vm747_vm14 = vcmp.eq.f32.partialorder %v2246_v24, inf  ;;  %1723 = vrsqrt.f32 %v2282_v56  ;;  %vm749_vm15 = vcmp.eq.f32.partialorder %v2246_v24, 0.0 }
  0xca   : > { %v2318_v19 = vpop.eup %1701  ;;  %v762_v53 = vsel %vm761_vm10, %v2226_v8, %v760_v15  ;;  %v750_v20 = vand.u32 2147483648, %v2246_v24  ;;  %1725 = vrsqrt.f32 %v2284_v57  ;;  %v854_v22 = vmul.f32 0.35355338, %v772_v14 }
  0xcb   : > { %v1704_v21 = vpop.eup %1703  ;;  %1727 = vrcp.f32 %v872_v10  ;;  %v765_v23 = vsel %vm763_vm11, %v764_v11, %v762_v53  ;;  %vm740_vm1 = vcmp.eq.f32.partialorder %v2248_v25, inf  ;;  %vm742_vm2 = vcmp.eq.f32.partialorder %v2248_v25, 0.0 }
  0xcc   : > { %v2316_v18 = vpop.xlane.xlu1 %268  ;;  %v2329_v26 = vpop.xlane.xlu0 %220  ;;  %1729 = vrcp.f32 %v871_v13  ;;  %v853_v28 = vmul.f32 0.35355338, %v765_v23  ;;  %v753_v29 = vmul.f32 %v1704_v21, %v2228_v9  ;;  %v743_v32 = vand.u32 2147483648, %v2248_v25 }
  0xcd   : > { %v2331_v27 = vpop.eup %1705  ;;  %vm420_vm3 = vcmp.eq.f32.partialorder %v2265_v43, inf  ;;  %v423_v33 = vand.u32 2147483648, %v2265_v43  ;;  %1731 = vrsqrt.f32 %v2294_v52  ;;  %vm422_vm4 = vcmp.eq.f32.partialorder %v2265_v43, 0.0 }
  0xce   : > { %v2339_v8 = vpop.eup %1707  ;;  %v755_v34 = vsel %vm754_vm12, %v2228_v9, %v753_v29  ;;  %vm308_vm5 = vcmp.eq.f32.partialorder %v2267_v30, inf  ;;  %v311_v35 = vand.u32 2147483648, %v2267_v30  ;;  %1733 = vrsqrt.f32 %v2296_v3 }
  0xcf   : > { %v1710_v37 = vpop.eup %1709  ;;  %v870_v38 = vadd.f32 0.0001, %v854_v22  ;;  %v758_v41 = vsel %vm756_vm13, %v757_v17, %v755_v34  ;;  %vm310_vm6 = vcmp.eq.f32.partialorder %v2267_v30, 0.0  ;;  %v913_v42 = vmul.f32 %v1694_v4, %v2036_v0 }
  0xd0   : > { %v2348_v36 = vpop.xlane.xlu1 %271  ;;  %1735 = vrsqrt.f32 %v2316_v18  ;;  %v1712_v44 = vpop.eup %1711  ;;  %v869_v31 = vadd.f32 0.0001, %v853_v28  ;;  %v746_v45 = vmul.f32 %v1710_v37, %v2246_v24  ;;  %vm427_vm7 = vcmp.eq.f32.partialorder %v2282_v56, inf }
  0xd1   : > { %v430_v46 = vand.u32 2147483648, %v2282_v56  ;;  %v2358_v47 = vpop.eup %1713  ;;  %v852_v48 = vmul.f32 0.35355338, %v758_v41  ;;  %v739_v9 = vmul.f32 %v1712_v44, %v2248_v25  ;;  %vm429_vm8 = vcmp.eq.f32.partialorder %v2282_v56, 0.0  ;;  %v2363_v49 = vpop.xlane.xlu0 %223 }
  0xd2   : > { %vm315_vm9 = vcmp.eq.f32.partialorder %v2284_v57, inf  ;;  %v929_v0 = vmul.f32 0.35355338, %v913_v42  ;;  %v2365_v50 = vpop.eup %1715  ;;  %v748_v51 = vsel %vm747_vm14, %v2246_v24, %v746_v45  ;;  %vm317_vm10 = vcmp.eq.f32.partialorder %v2284_v57, 0.0 }
  0xd3   : > { %v318_v54 = vand.u32 2147483648, %v2284_v57  ;;  %1737 = vrsqrt.f32 %v2329_v26  ;;  %v1718_v55 = vpop.eup %1717  ;;  %v751_v39 = vsel %vm749_vm15, %v750_v20, %v748_v51  ;;  %v741_v40 = vsel %vm740_vm1, %v2248_v25, %v739_v9 }
  0xd4   : > { %1739 = vrcp.f32 %v870_v38  ;;  %v437_v58 = vand.u32 2147483648, %v2294_v52  ;;  %1516 = vmatprep.subr.msk.mxu0 %vm209_vm0, %v929_v0  ;;  %1596 = vmatprep.subr.msk.mxu1 %vm209_vm0, %v929_v0  ;;  %v1720_v59 = vpop.eup %1719  ;;  %v851_v60 = vmul.f32 0.35355338, %v751_v39  ;;  %v744_v61 = vsel %vm742_vm2, %v743_v32, %v741_v40  ;;  %v2387_v24 = vpop.xlane.xlu1 %274 }
  0xd5   : > { %1741 = vrcp.f32 %v869_v31  ;;  %v419_v62 = vmul.f32 %v1718_v55, %v2265_v43  ;;  %vm434_vm11 = vcmp.eq.f32.partialorder %v2294_v52, inf  ;;  %1517 = vmatpush3.xpose.msk.msra.mxu0 %vm209_vm0, %v929_v0  ;;  %1612 = vmatpush3.xpose.msk.msra.mxu1 %vm209_vm0, %v929_v0  ;;  %v2389_v63 = vpop.eup %1721  ;;  %v868_v4 = vadd.f32 0.0001, %v852_v48  ;;  %v2413_v53 = vpop.xlane.xlu0 %226 }
  0xd6   : > { %v850_v5 = vmul.f32 0.35355338, %v744_v61  ;;  %v307_v7 = vmul.f32 %v1720_v59, %v2267_v30  ;;  %vm436_vm12 = vcmp.eq.f32.partialorder %v2294_v52, 0.0  ;;  %vm322_vm13 = vcmp.eq.f32.partialorder %v2296_v3, inf  ;;  %v1724_v10 = vpop.eup %1723 }
  0xd7   : > { %v911_v25 = vmul.f32 %v2310_v16, %v2046_v2  ;;  %v421_v11 = vsel %vm420_vm3, %v2265_v43, %v419_v62  ;;  %vm324_vm14 = vcmp.eq.f32.partialorder %v2296_v3, 0.0  ;;  %v325_v13 = vand.u32 2147483648, %v2296_v3  ;;  %v1726_v14 = vpop.eup %1725 }
  0xd8   : > { %vm441_vm15 = vcmp.eq.f32.partialorder %v2316_v18, inf  ;;  %1743 = vrsqrt.f32 %v2348_v36  ;;  %v424_v15 = vsel %vm422_vm4, %v423_v33, %v421_v11  ;;  %v309_v2 = vsel %vm308_vm5, %v2267_v30, %v307_v7  ;;  %v2415_v20 = vpop.eup %1727 }
  0xd9   : > { %v426_v16 = vmul.f32 %v1724_v10, %v2282_v56  ;;  %v909_v17 = vmul.f32 %v2305_v12, %v2041_v1  ;;  %v867_v21 = vadd.f32 0.0001, %v851_v60  ;;  %v546_v22 = vmul.f32 0.35355338, %v424_v15  ;;  %v2422_v28 = vpop.eup %1729  ;;  %v2450_v0 = vpop.xlane.xlu0 %229 }
  0xda   : > { %v312_v43 = vsel %vm310_vm6, %v311_v35, %v309_v2  ;;  %v314_v23 = vmul.f32 %v1726_v14, %v2284_v57  ;;  %1745 = vrcp.f32 %v868_v4  ;;  %v866_v29 = vadd.f32 0.0001, %v850_v5  ;;  %v1732_v32 = vpop.eup %1731  ;;  %v2432_v35 = vpop.xlane.xlu1 %277 }
  0xdb   : > { %v428_v1 = vsel %vm427_vm7, %v2282_v56, %v426_v16  ;;  %v928_v12 = vmul.f32 0.35355338, %v911_v25  ;;  %v578_v33 = vadd.f32 0.0001, %v546_v22  ;;  %v530_v34 = vmul.f32 0.35355338, %v312_v43  ;;  %v1734_v38 = vpop.eup %1733 }
  0xdc   : > { %v431_v37 = vsel %vm429_vm8, %v430_v46, %v428_v1  ;;  %v316_v30 = vsel %vm315_vm9, %v2284_v57, %v314_v23  ;;  %v433_v44 = vmul.f32 %v1732_v32, %v2294_v52  ;;  %v927_v31 = vmul.f32 0.35355338, %v909_v17  ;;  %v1861_v1 = vld [vmem:[%s3082_s1 + $0x58] sm:$0xff] }
  0xdd   : > { %v547_v41 = vmul.f32 0.35355338, %v431_v37  ;;  %v319_v42 = vsel %vm317_vm10, %v318_v54, %v316_v30  ;;  %1518 = vmatprep.subr.msk.mxu0 %vm209_vm0, %v928_v12  ;;  %1597 = vmatprep.subr.msk.mxu1 %vm209_vm0, %v928_v12  ;;  %v1736_v56 = vpop.eup %1735  ;;  %1747 = vrcp.f32 %v867_v21  ;;  %v321_v46 = vmul.f32 %v1734_v38, %v2296_v3  ;;  %v2481_v15 = vpop.xlane.xlu0 %232  ;;  %v1862_v38 = vld [vmem:[%s3082_s1 + $0x50] sm:$0xff] }
  0xde   : > { %v531_v45 = vmul.f32 0.35355338, %v319_v42  ;;  %vm443_vm1 = vcmp.eq.f32.partialorder %v2316_v18, 0.0  ;;  %1519 = vmatpush3.xpose.msk.msra.mxu0 %vm209_vm0, %v928_v12  ;;  %1613 = vmatpush3.xpose.msk.msra.mxu1 %vm209_vm0, %v928_v12  ;;  %1749 = vrcp.f32 %v866_v29  ;;  %v435_v57 = vsel %vm434_vm11, %v2294_v52, %v433_v44  ;;  %v2471_v7 = vpop.xlane.xlu1 %280 }
  0xdf   : > { %v440_v48 = vmul.f32 %v1736_v56, %v2316_v18  ;;  %v444_v9 = vand.u32 2147483648, %v2316_v18  ;;  %1520 = vmatprep.subr.msk.mxu0 %vm209_vm0, %v927_v31  ;;  %1598 = vmatprep.subr.msk.mxu1 %vm209_vm0, %v927_v31  ;;  %1751 = vrcp.f32 %v578_v33  ;;  %v562_v51 = vadd.f32 0.0001, %v530_v34 }
  0xe0   : > { %v438_v54 = vsel %vm436_vm12, %v437_v58, %v435_v57  ;;  %v323_v55 = vsel %vm322_vm13, %v2296_v3, %v321_v46  ;;  %v1738_v39 = vpop.eup %1737  ;;  %v579_v40 = vadd.f32 0.0001, %v547_v41  ;;  %v563_v4 = vadd.f32 0.0001, %v531_v45  ;;  %v1863_v45 = vld [vmem:[%s3082_s1 + $0x48] sm:$0xff] }
  0xe1   : > { %v548_v59 = vmul.f32 0.35355338, %v438_v54  ;;  %v326_v60 = vsel %vm324_vm14, %v325_v13, %v323_v55  ;;  %v442_v61 = vsel %vm441_vm15, %v2316_v18, %v440_v48  ;;  %v2464_v62 = vpop.eup %1739  ;;  %v328_v58 = vmul.f32 %v1738_v39, %v2329_v26  ;;  %v2506_v32 = vpop.xlane.xlu0 %235  ;;  %v1864_v39 = vld [vmem:[%s3082_s1 + $0x40] sm:$0xff] }
  0xe2   : > { %v532_v5 = vmul.f32 0.35355338, %v326_v60  ;;  %v445_v52 = vsel %vm443_vm1, %v444_v9, %v442_v61  ;;  %1521 = vmatpush3.xpose.msk.msra.mxu0 %vm209_vm0, %v927_v31  ;;  %1614 = vmatpush3.xpose.msk.msra.mxu1 %vm209_vm0, %v927_v31  ;;  %v2473_v3 = vpop.eup %1741  ;;  %vm329_vm2 = vcmp.eq.f32.partialorder %v2329_v26, inf  ;;  %1753 = vrsqrt.f32 %v2363_v49 }
  0xe3   : > { %v580_v25 = vadd.f32 0.0001, %v548_v59  ;;  %1755 = vrcp.f32 %v562_v51  ;;  %v330_v10 = vsel %vm329_vm2, %v2329_v26, %v328_v58  ;;  %v549_v11 = vmul.f32 0.35355338, %v445_v52 }
  0xe4   : > { %1757 = vrcp.f32 %v579_v40  ;;  %v332_v13 = vand.u32 2147483648, %v2329_v26  ;;  %v907_v14 = vmul.f32 %v2318_v19, %v2057_v6  ;;  %v564_v2 = vadd.f32 0.0001, %v532_v5  ;;  %v2491_v6 = vpop.xlane.xlu1 %283 }
  0xe5   : > { %v1744_v18 = vpop.eup %1743  ;;  %1759 = vrcp.f32 %v563_v4  ;;  %vm331_vm3 = vcmp.eq.f32.partialorder %v2329_v26, 0.0  ;;  %vm448_vm4 = vcmp.eq.f32.partialorder %v2348_v36, inf  ;;  %v451_v23 = vand.u32 2147483648, %v2348_v36  ;;  %v2543_v54 = vpop.xlane.xlu0 %238 }
  0xe6   : > { %v447_v16 = vmul.f32 %v1744_v18, %v2348_v36  ;;  %1761 = vrcp.f32 %v580_v25  ;;  %v333_v17 = vsel %vm331_vm3, %v332_v13, %v330_v10  ;;  %v926_v21 = vmul.f32 0.35355338, %v907_v14  ;;  %v1866_v14 = vld [vmem:[%s2113_s17] sm:$0xff] }
  0xe7   : > { %v2486_v22 = vpop.eup %1745  ;;  %1763 = vrsqrt.f32 %v2387_v24  ;;  %v581_v19 = vadd.f32 0.0001, %v549_v11  ;;  %vm450_vm5 = vcmp.eq.f32.partialorder %v2348_v36, 0.0  ;;  %v533_v26 = vmul.f32 0.35355338, %v333_v17  ;;  %v1865_v11 = vld [vmem:[%s3082_s1 + $0x38] sm:$0xff] }
  0xe8   : > { %v449_v43 = vsel %vm448_vm4, %v2348_v36, %v447_v16  ;;  %1522 = vmatprep.subr.msk.mxu0 %vm209_vm0, %v926_v21  ;;  %1599 = vmatprep.subr.msk.mxu1 %vm209_vm0, %v926_v21  ;;  %1765 = vrsqrt.f32 %v2413_v53  ;;  %v905_v12 = vmul.f32 %v1861_v1, %v2331_v27  ;;  %v903_v27 = vmul.f32 %v1862_v38, %v2339_v8  ;;  %v2522_v42 = vpop.xlane.xlu1 %286  ;;  %v1867_v16 = vld [vmem:[%s2113_s17 + $0x80] sm:$0xff] }
  0xe9   : > { %1767 = vrcp.f32 %v564_v2  ;;  %v452_v29 = vsel %vm450_vm5, %v451_v23, %v449_v43  ;;  %1523 = vmatpush3.xpose.msk.msra.mxu0 %vm209_vm0, %v926_v21  ;;  %1615 = vmatpush3.xpose.msk.msra.mxu1 %vm209_vm0, %v926_v21  ;;  %v565_v41 = vadd.f32 0.0001, %v533_v26  ;;  %vm336_vm6 = vcmp.eq.f32.partialorder %v2363_v49, inf }
  0xea   : > { %v2503_v36 = vpop.eup %1747  ;;  %1769 = vrsqrt.f32 %v2432_v35  ;;  %v925_v34 = vmul.f32 0.35355338, %v905_v12  ;;  %v550_v30 = vmul.f32 0.35355338, %v452_v29  ;;  %vm338_vm7 = vcmp.eq.f32.partialorder %v2363_v49, 0.0 }
  0xeb   : > { %v2508_v33 = vpop.eup %1749  ;;  %1771 = vrsqrt.f32 %v2450_v0  ;;  %v339_v44 = vand.u32 2147483648, %v2363_v49  ;;  %vm455_vm8 = vcmp.eq.f32.partialorder %v2387_v24, inf  ;;  %v924_v8 = vmul.f32 0.35355338, %v903_v27 }
  0xec   : > { %v2511_v37 = vpop.eup %1751  ;;  %1773 = vrsqrt.f32 %v2471_v7  ;;  %1524 = vmatprep.subr.msk.mxu0 %vm209_vm0, %v925_v34  ;;  %1600 = vmatprep.subr.msk.mxu1 %vm209_vm0, %v925_v34  ;;  %vm457_vm9 = vcmp.eq.f32.partialorder %v2387_v24, 0.0  ;;  %v458_v56 = vand.u32 2147483648, %v2387_v24  ;;  %vm343_vm10 = vcmp.eq.f32.partialorder %v2413_v53, inf  ;;  %v2573_v52 = vpop.xlane.xlu1 %289 }
  0xed   : > { %1775 = vrcp.f32 %v581_v19  ;;  %1525 = vmatpush3.xpose.msk.msra.mxu0 %vm209_vm0, %v925_v34  ;;  %1616 = vmatpush3.xpose.msk.msra.mxu1 %vm209_vm0, %v925_v34  ;;  %v901_v46 = vmul.f32 %v1863_v45, %v2358_v47  ;;  %v582_v48 = vadd.f32 0.0001, %v550_v30  ;;  %vm345_vm11 = vcmp.eq.f32.partialorder %v2413_v53, 0.0 }
  0xee   : > { %1777 = vrsqrt.f32 %v2481_v15  ;;  %v346_v51 = vand.u32 2147483648, %v2413_v53  ;;  %1526 = vmatprep.subr.msk.mxu0 %vm209_vm0, %v924_v8  ;;  %1601 = vmatprep.subr.msk.mxu1 %vm209_vm0, %v924_v8  ;;  %vm462_vm12 = vcmp.eq.f32.partialorder %v2432_v35, inf  ;;  %v899_v40 = vmul.f32 %v1864_v39, %v2365_v50 }
  0xef   : > { %v1754_v31 = vpop.eup %1753  ;;  %1779 = vrsqrt.f32 %v2491_v6  ;;  %v923_v47 = vmul.f32 0.35355338, %v901_v46  ;;  %vm464_vm13 = vcmp.eq.f32.partialorder %v2432_v35, 0.0  ;;  %v465_v61 = vand.u32 2147483648, %v2432_v35 }
  0xf0   : > { %v1756_v57 = vpop.eup %1755  ;;  %v335_v9 = vmul.f32 %v1754_v31, %v2363_v49  ;;  %1781 = vrsqrt.f32 %v2506_v32  ;;  %vm350_vm14 = vcmp.eq.f32.partialorder %v2450_v0, inf  ;;  %vm352_vm15 = vcmp.eq.f32.partialorder %v2450_v0, 0.0 }
  0xf1   : > { %v2545_v55 = vpop.eup %1757  ;;  %1783 = vrcp.f32 %v565_v41  ;;  %1527 = vmatpush3.xpose.msk.msra.mxu0 %vm209_vm0, %v924_v8  ;;  %1617 = vmatpush3.xpose.msk.msra.mxu1 %vm209_vm0, %v924_v8  ;;  %v353_v5 = vand.u32 2147483648, %v2450_v0  ;;  %vm469_vm1 = vcmp.eq.f32.partialorder %v2471_v7, inf  ;;  %vm471_vm2 = vcmp.eq.f32.partialorder %v2471_v7, 0.0 }
  0xf2   : > { %v2552_v59 = vpop.eup %1759  ;;  %v337_v60 = vsel %vm336_vm6, %v2363_v49, %v335_v9  ;;  %1785 = vrsqrt.f32 %v2522_v42  ;;  %1528 = vmatprep.subr.msk.mxu0 %vm209_vm0, %v923_v47  ;;  %1602 = vmatprep.subr.msk.mxu1 %vm209_vm0, %v923_v47  ;;  %v472_v49 = vand.u32 2147483648, %v2471_v7  ;;  %v922_v25 = vmul.f32 0.35355338, %v899_v40 }
  0xf3   : > { %v2563_v4 = vpop.eup %1761  ;;  %v340_v50 = vsel %vm338_vm7, %v339_v44, %v337_v60  ;;  %1787 = vrsqrt.f32 %v2543_v54  ;;  %v897_v13 = vmul.f32 %v1865_v11, %v2389_v63  ;;  %v595_v2 = vmul.f32 %v1866_v14, %v1756_v57  ;;  %v2593_v63 = vpop.xlane.xlu0 %241 }
  0xf4   : > { %v1764_v58 = vpop.eup %1763  ;;  %1789 = vrcp.f32 %v582_v48  ;;  %v627_v17 = vmul.f32 %v1867_v16, %v2511_v37  ;;  %v534_v43 = vmul.f32 0.35355338, %v340_v50  ;;  %vm357_vm3 = vcmp.eq.f32.partialorder %v2481_v15, inf }
  0xf5   : > { %v1766_v10 = vpop.eup %1765  ;;  %v454_v18 = vmul.f32 %v1764_v58, %v2387_v24  ;;  %v360_v19 = vand.u32 2147483648, %v2481_v15  ;;  %1529 = vmatpush3.xpose.msk.msra.mxu0 %vm209_vm0, %v923_v47  ;;  %1618 = vmatpush3.xpose.msk.msra.mxu1 %vm209_vm0, %v923_v47  ;;  %1791 = vrsqrt.f32 %v2573_v52  ;;  %vm359_vm4 = vcmp.eq.f32.partialorder %v2481_v15, 0.0 }
  0xf6   : > { %v2585_v21 = vpop.eup %1767  ;;  %v342_v23 = vmul.f32 %v1766_v10, %v2413_v53  ;;  %vm476_vm5 = vcmp.eq.f32.partialorder %v2491_v6, inf  ;;  %v479_v1 = vand.u32 2147483648, %v2491_v6  ;;  %v367_v12 = vand.u32 2147483648, %v2506_v32  ;;  %1530 = vmatprep.subr.msk.mxu0 %vm209_vm0, %v922_v25  ;;  %1603 = vmatprep.subr.msk.mxu1 %vm209_vm0, %v922_v25 }
  0xf7   : > { %v1770_v26 = vpop.eup %1769  ;;  %v456_v29 = vsel %vm455_vm8, %v2387_v24, %v454_v18  ;;  %vm478_vm6 = vcmp.eq.f32.partialorder %v2491_v6, 0.0  ;;  %vm364_vm7 = vcmp.eq.f32.partialorder %v2506_v32, inf  ;;  %v921_v27 = vmul.f32 0.35355338, %v897_v13  ;;  %1548 = vmatprep.mubr.msk.f32.mxu0 %vm209_vm0, %v595_v2  ;;  %1572 = vmatprep.mubr.msk.f32.mxu1 %vm209_vm0, %v627_v17  ;;  %v2653_v50 = vpop.xlane.xlu0 %244 }
  0xf8   : > { %v1772_v34 = vpop.eup %1771  ;;  %v459_v37 = vsel %vm457_vm9, %v458_v56, %v456_v29  ;;  %v344_v30 = vsel %vm343_vm10, %v2413_v53, %v342_v23  ;;  %v461_v38 = vmul.f32 %v1770_v26, %v2432_v35  ;;  %vm366_vm8 = vcmp.eq.f32.partialorder %v2506_v32, 0.0  ;;  %v2631_v53 = vpop.xlane.xlu1 %292 }
  0xf9   : > { %v1774_v41 = vpop.eup %1773  ;;  %v551_v44 = vmul.f32 0.35355338, %v459_v37  ;;  %v347_v24 = vsel %vm345_vm11, %v346_v51, %v344_v30  ;;  %v349_v8 = vmul.f32 %v1772_v34, %v2450_v0  ;;  %1793 = vrsqrt.f32 %v2593_v63  ;;  %1531 = vmatpush3.xpose.msk.msra.mxu0 %vm209_vm0, %v922_v25  ;;  %1619 = vmatpush3.xpose.msk.msra.mxu1 %vm209_vm0, %v922_v25 }
  0xfa   : > { %v2623_v31 = vpop.eup %1775  ;;  %v566_v56 = vadd.f32 0.0001, %v534_v43  ;;  %v535_v45 = vmul.f32 0.35355338, %v347_v24  ;;  %v463_v46 = vsel %vm462_vm12, %v2432_v35, %v461_v38  ;;  %v468_v57 = vmul.f32 %v1774_v41, %v2471_v7  ;;  %1532 = vmatprep.subr.msk.mxu0 %vm209_vm0, %v921_v27  ;;  %1604 = vmatprep.subr.msk.mxu1 %vm209_vm0, %v921_v27 }
  0xfb   : > { %v1778_v48 = vpop.eup %1777  ;;  %v466_v9 = vsel %vm464_vm13, %v465_v61, %v463_v46  ;;  %v351_v51 = vsel %vm350_vm14, %v2450_v0, %v349_v8  ;;  %vm483_vm9 = vcmp.eq.f32.partialorder %v2522_v42, inf  ;;  %v486_v47 = vand.u32 2147483648, %v2522_v42 }
  0xfc   : > { %v1780_v39 = vpop.eup %1779  ;;  %v583_v40 = vadd.f32 0.0001, %v551_v44  ;;  %v552_v60 = vmul.f32 0.35355338, %v466_v9  ;;  %v354_v35 = vsel %vm352_vm15, %v353_v5, %v351_v51  ;;  %v470_v61 = vsel %vm469_vm1, %v2471_v7, %v468_v57  ;;  %v2680_v29 = vpop.xlane.xlu1 %295 }
  0xfd   : > { %vm485_vm10 = vcmp.eq.f32.partialorder %v2522_v42, 0.0  ;;  %vm371_vm11 = vcmp.eq.f32.partialorder %v2543_v54, inf  ;;  %v1782_v58 = vpop.eup %1781  ;;  %v536_v25 = vmul.f32 0.35355338, %v354_v35  ;;  %v473_v10 = vsel %vm471_vm2, %v472_v49, %v470_v61  ;;  %1533 = vmatpush3.xpose.msk.msra.mxu0 %vm209_vm0, %v921_v27  ;;  %1620 = vmatpush3.xpose.msk.msra.mxu1 %vm209_vm0, %v921_v27  ;;  %v2696_v44 = vpop.xlane.xlu0 %247 }
  0xfe   : > { %v356_v0 = vmul.f32 %v1778_v48, %v2481_v15  ;;  %vm373_vm12 = vcmp.eq.f32.partialorder %v2543_v54, 0.0  ;;  %v374_v5 = vand.u32 2147483648, %v2543_v54  ;;  %v2662_v18 = vpop.eup %1783  ;;  %1795 = vrcp.f32 %v566_v56 }
  0xff   : > { %v567_v11 = vadd.f32 0.0001, %v535_v45  ;;  %v475_v13 = vmul.f32 %v1780_v39, %v2491_v6  ;;  %vm490_vm13 = vcmp.eq.f32.partialorder %v2573_v52, inf  ;;  %v1786_v7 = vpop.eup %1785  ;;  %v584_v49 = vadd.f32 0.0001, %v552_v60 }
 0x100   : > { %v553_v14 = vmul.f32 0.35355338, %v473_v10  ;;  %v358_v2 = vsel %vm357_vm3, %v2481_v15, %v356_v0  ;;  %v363_v16 = vmul.f32 %v1782_v58, %v2506_v32  ;;  %v1788_v17 = vpop.eup %1787  ;;  %1797 = vrcp.f32 %v583_v40  ;;  %v2718_v60 = vpop.xlane.xlu1 %298 }
 0x101   : > { %v361_v43 = vsel %vm359_vm4, %v360_v19, %v358_v2  ;;  %v477_v23 = vsel %vm476_vm5, %v2491_v6, %v475_v13  ;;  %v493_v26 = vand.u32 2147483648, %v2573_v52  ;;  %v2682_v34 = vpop.eup %1789  ;;  %v568_v37 = vadd.f32 0.0001, %v536_v25  ;;  %v2723_v25 = vpop.xlane.xlu0 %250  ;;  %v1869_v13 = vld [vmem:[%s3082_s1 + $0x28] sm:$0xff] }
 0x102   : > { %v537_v30 = vmul.f32 0.35355338, %v361_v43  ;;  %v480_v38 = vsel %vm478_vm6, %v479_v1, %v477_v23  ;;  %v365_v15 = vsel %vm364_vm7, %v2506_v32, %v363_v16  ;;  %1799 = vrcp.f32 %v567_v11  ;;  %v1792_v24 = vpop.eup %1791  ;;  %v1868_v32 = vld [vmem:[%s3082_s1 + $0x30] sm:$0xff] }
 0x103   : > { %v554_v19 = vmul.f32 0.35355338, %v480_v38  ;;  %v368_v27 = vsel %vm366_vm8, %v367_v12, %v365_v15  ;;  %v482_v41 = vmul.f32 %v1786_v7, %v2522_v42  ;;  %1801 = vrcp.f32 %v584_v49 }
 0x104   : > { %v585_v8 = vadd.f32 0.0001, %v553_v14  ;;  %v538_v6 = vmul.f32 0.35355338, %v368_v27  ;;  %v370_v1 = vmul.f32 %v1788_v17, %v2543_v54  ;;  %v489_v45 = vmul.f32 %v1792_v24, %v2573_v52  ;;  %v2739_v49 = vpop.xlane.xlu1 %301 }
 0x105   : > { %v484_v56 = vsel %vm483_vm9, %v2522_v42, %v482_v41  ;;  %v895_v12 = vmul.f32 %v1868_v32, %v2415_v20  ;;  %1803 = vrsqrt.f32 %v2631_v53  ;;  %v569_v46 = vadd.f32 0.0001, %v537_v30  ;;  %v2745_v17 = vpop.xlane.xlu0 %253  ;;  %v1872_v32 = vld [vmem:[%s3082_s1 + $0x10] sm:$0xff] }
 0x106   : > { %1805 = vrcp.f32 %v568_v37  ;;  %v487_v57 = vsel %vm485_vm10, %v486_v47, %v484_v56  ;;  %v372_v48 = vsel %vm371_vm11, %v2543_v54, %v370_v1  ;;  %v1794_v9 = vpop.eup %1793  ;;  %v586_v51 = vadd.f32 0.0001, %v554_v19 }
 0x107   : > { %v555_v39 = vmul.f32 0.35355338, %v487_v57  ;;  %v375_v40 = vsel %vm373_vm12, %v374_v5, %v372_v48  ;;  %v491_v20 = vsel %vm490_vm13, %v2573_v52, %v489_v45  ;;  %1807 = vrcp.f32 %v585_v8 }
 0x108   : > { %v570_v35 = vadd.f32 0.0001, %v538_v6  ;;  %v539_v42 = vmul.f32 0.35355338, %v375_v40  ;;  %v377_v47 = vmul.f32 %v1794_v9, %v2593_v63  ;;  %vm492_vm14 = vcmp.eq.f32.partialorder %v2573_v52, 0.0  ;;  %v2769_v27 = vpop.xlane.xlu1 %304 }
 0x109   : > { %v587_v61 = vadd.f32 0.0001, %v555_v39  ;;  %v920_v58 = vmul.f32 0.35355338, %v895_v12  ;;  %1809 = vrsqrt.f32 %v2653_v50  ;;  %v494_v54 = vsel %vm492_vm14, %v493_v26, %v491_v20  ;;  %v2780_v1 = vpop.xlane.xlu0 %256  ;;  %v1873_v20 = vld [vmem:[%s3082_s1 + $0x8] sm:$0xff] }
 0x10a   : > { %1811 = vrcp.f32 %v569_v46  ;;  %vm378_vm15 = vcmp.eq.f32.partialorder %v2593_v63, inf  ;;  %v571_v52 = vadd.f32 0.0001, %v539_v42  ;;  %v381_v5 = vand.u32 2147483648, %v2593_v63 }
 0x10b   : > { %1813 = vrcp.f32 %v586_v51  ;;  %v379_v10 = vsel %vm378_vm15, %v2593_v63, %v377_v47  ;;  %1534 = vmatprep.subr.msk.mxu0 %vm209_vm0, %v920_v58  ;;  %1605 = vmatprep.subr.msk.mxu1 %vm209_vm0, %v920_v58  ;;  %v2729_v0 = vpop.eup %1795  ;;  %v556_v11 = vmul.f32 0.35355338, %v494_v54  ;;  %vm380_vm1 = vcmp.eq.f32.partialorder %v2593_v63, 0.0  ;;  %v1870_v63 = vld [vmem:[%s3082_s1 + $0x20] sm:$0xff] }
 0x10c   : > { %1815 = vrcp.f32 %v570_v35  ;;  %1535 = vmatpush3.xpose.msk.msra.mxu0 %vm209_vm0, %v920_v58  ;;  %1621 = vmatpush3.xpose.msk.msra.mxu1 %vm209_vm0, %v920_v58  ;;  %v893_v7 = vmul.f32 %v1869_v13, %v2422_v28  ;;  %v382_v2 = vsel %vm380_vm1, %v381_v5, %v379_v10  ;;  %v891_v28 = vmul.f32 %v1870_v63, %v2464_v62  ;;  %v1871_v62 = vld [vmem:[%s3082_s1 + $0x18] sm:$0xff] }
 0x10d   : > { %1817 = vrcp.f32 %v587_v61  ;;  %v2741_v14 = vpop.eup %1797  ;;  %v588_v26 = vadd.f32 0.0001, %v556_v11  ;;  %v540_v37 = vmul.f32 0.35355338, %v382_v2  ;;  %vm497_vm2 = vcmp.eq.f32.partialorder %v2631_v53, inf }
 0x10e   : > { %1819 = vrsqrt.f32 %v2680_v29  ;;  %v919_v16 = vmul.f32 0.35355338, %v893_v7  ;;  %v918_v38 = vmul.f32 0.35355338, %v891_v28  ;;  %v889_v19 = vmul.f32 %v1871_v62, %v2473_v3  ;;  %v1874_v7 = vld [vmem:[%s3082_s1] sm:$0xff] }
 0x10f   : > { %1821 = vrsqrt.f32 %v2696_v44  ;;  %v2747_v43 = vpop.eup %1799  ;;  %vm499_vm3 = vcmp.eq.f32.partialorder %v2631_v53, 0.0  ;;  %v500_v24 = vand.u32 2147483648, %v2631_v53  ;;  %v572_v3 = vadd.f32 0.0001, %v540_v37 }
 0x110   : > { %1823 = vrcp.f32 %v571_v52  ;;  %v2753_v23 = vpop.eup %1801  ;;  %1536 = vmatprep.subr.msk.mxu0 %vm209_vm0, %v919_v16  ;;  %1606 = vmatprep.subr.msk.mxu1 %vm209_vm0, %v919_v16  ;;  %vm385_vm4 = vcmp.eq.f32.partialorder %v2653_v50, inf  ;;  %v917_v6 = vmul.f32 0.35355338, %v889_v19  ;;  %vm387_vm5 = vcmp.eq.f32.partialorder %v2653_v50, 0.0 }
 0x111   : > { %1825 = vrsqrt.f32 %v2718_v60  ;;  %1537 = vmatpush3.xpose.msk.msra.mxu0 %vm209_vm0, %v919_v16  ;;  %1622 = vmatpush3.xpose.msk.msra.mxu1 %vm209_vm0, %v919_v16  ;;  %v388_v45 = vand.u32 2147483648, %v2653_v50  ;;  %v887_v12 = vmul.f32 %v1872_v32, %v2486_v22  ;;  %vm504_vm6 = vcmp.eq.f32.partialorder %v2680_v29, inf }
 0x112   : > { %v1804_v30 = vpop.eup %1803  ;;  %1827 = vrsqrt.f32 %v2723_v25  ;;  %1538 = vmatprep.subr.msk.mxu0 %vm209_vm0, %v918_v38  ;;  %1607 = vmatprep.subr.msk.mxu1 %vm209_vm0, %v918_v38  ;;  %vm506_vm7 = vcmp.eq.f32.partialorder %v2680_v29, 0.0  ;;  %v507_v57 = vand.u32 2147483648, %v2680_v29  ;;  %vm392_vm8 = vcmp.eq.f32.partialorder %v2696_v44, inf }
 0x113   : > { %v2761_v15 = vpop.eup %1805  ;;  %1829 = vrsqrt.f32 %v2739_v49  ;;  %v496_v41 = vmul.f32 %v1804_v30, %v2631_v53  ;;  %vm394_vm9 = vcmp.eq.f32.partialorder %v2696_v44, 0.0  ;;  %v395_v39 = vand.u32 2147483648, %v2696_v44 }
 0x114   : > { %1831 = vrsqrt.f32 %v2745_v17  ;;  %v2777_v8 = vpop.eup %1807  ;;  %v916_v40 = vmul.f32 0.35355338, %v887_v12  ;;  %v885_v35 = vmul.f32 %v1873_v20, %v2503_v36  ;;  %vm511_vm10 = vcmp.eq.f32.partialorder %v2718_v60, inf }
 0x115   : > { %1833 = vrcp.f32 %v588_v26  ;;  %1539 = vmatpush3.xpose.msk.msra.mxu0 %vm209_vm0, %v918_v38  ;;  %1623 = vmatpush3.xpose.msk.msra.mxu1 %vm209_vm0, %v918_v38  ;;  %v498_v22 = vsel %vm497_vm2, %v2631_v53, %v496_v41  ;;  %vm513_vm11 = vcmp.eq.f32.partialorder %v2718_v60, 0.0  ;;  %v514_v47 = vand.u32 2147483648, %v2718_v60 }
 0x116   : > { %v1810_v56 = vpop.eup %1809  ;;  %1835 = vrsqrt.f32 %v2769_v27  ;;  %1540 = vmatprep.subr.msk.mxu0 %vm209_vm0, %v917_v6  ;;  %1608 = vmatprep.subr.msk.mxu1 %vm209_vm0, %v917_v6  ;;  %vm399_vm12 = vcmp.eq.f32.partialorder %v2723_v25, inf  ;;  %v501_v58 = vsel %vm499_vm3, %v500_v24, %v498_v22  ;;  %vm401_vm13 = vcmp.eq.f32.partialorder %v2723_v25, 0.0 }
 0x117   : > { %v2791_v46 = vpop.eup %1811  ;;  %v384_v9 = vmul.f32 %v1810_v56, %v2653_v50  ;;  %1837 = vrsqrt.f32 %v2780_v1  ;;  %v402_v36 = vand.u32 2147483648, %v2723_v25  ;;  %vm518_vm14 = vcmp.eq.f32.partialorder %v2739_v49, inf }
 0x118   : > { %v2799_v48 = vpop.eup %1813  ;;  %1839 = vrcp.f32 %v572_v3  ;;  %vm520_vm15 = vcmp.eq.f32.partialorder %v2739_v49, 0.0  ;;  %v521_v53 = vand.u32 2147483648, %v2739_v49  ;;  %vm406_vm1 = vcmp.eq.f32.partialorder %v2745_v17, inf }
 0x119   : > { %v2807_v51 = vpop.eup %1815  ;;  %1541 = vmatpush3.xpose.msk.msra.mxu0 %vm209_vm0, %v917_v6  ;;  %1624 = vmatpush3.xpose.msk.msra.mxu1 %vm209_vm0, %v917_v6  ;;  %v386_v10 = vsel %vm385_vm4, %v2653_v50, %v384_v9  ;;  %v915_v13 = vmul.f32 0.35355338, %v885_v35  ;;  %v883_v2 = vmul.f32 %v1874_v7, %v2508_v33  ;;  %v557_v63 = vmul.f32 0.35355338, %v501_v58 }
 0x11a   : > { %v2814_v42 = vpop.eup %1817  ;;  %1542 = vmatprep.subr.msk.mxu0 %vm209_vm0, %v916_v40  ;;  %1609 = vmatprep.subr.msk.mxu1 %vm209_vm0, %v916_v40  ;;  %vm408_vm2 = vcmp.eq.f32.partialorder %v2745_v17, 0.0  ;;  %v409_v26 = vand.u32 2147483648, %v2745_v17  ;;  %v389_v30 = vsel %vm387_vm5, %v388_v45, %v386_v10  ;;  %vm525_vm3 = vcmp.eq.f32.partialorder %v2769_v27, inf }
 0x11b   : > { %v1820_v61 = vpop.eup %1819  ;;  %v528_v62 = vand.u32 2147483648, %v2769_v27  ;;  %vm527_vm4 = vcmp.eq.f32.partialorder %v2769_v27, 0.0  ;;  %vm413_vm5 = vcmp.eq.f32.partialorder %v2780_v1, inf  ;;  %v541_v32 = vmul.f32 0.35355338, %v389_v30 }
 0x11c   : > { %v1822_v54 = vpop.eup %1821  ;;  %v503_v52 = vmul.f32 %v1820_v61, %v2680_v29  ;;  %v589_v9 = vadd.f32 0.0001, %v557_v63  ;;  %v416_v61 = vand.u32 2147483648, %v2780_v1  ;;  %v1877_v63 = vld [vmem:[%s2113_s17 + $0x10] sm:$0xff] }
 0x11d   : > { %v2835_v5 = vpop.eup %1823  ;;  %v391_v11 = vmul.f32 %v1822_v54, %v2696_v44  ;;  %1543 = vmatpush3.xpose.msk.msra.mxu0 %vm209_vm0, %v916_v40  ;;  %1625 = vmatpush3.xpose.msk.msra.mxu1 %vm209_vm0, %v916_v40  ;;  %v1875_v54 = vld [vmem:[%s2113_s17 + $0x8] sm:$0xff] }
 0x11e   : > { %v1826_v16 = vpop.eup %1825  ;;  %v505_v28 = vsel %vm504_vm6, %v2680_v29, %v503_v52  ;;  %1544 = vmatprep.subr.msk.mxu0 %vm209_vm0, %v915_v13  ;;  %1610 = vmatprep.subr.msk.mxu1 %vm209_vm0, %v915_v13  ;;  %vm415_vm6 = vcmp.eq.f32.partialorder %v2780_v1, 0.0  ;;  %v914_v29 = vmul.f32 0.35355338, %v883_v2  ;;  %v597_v10 = vmul.f32 %v1875_v54, %v2552_v59  ;;  %v1876_v52 = vld [vmem:[%s2113_s17 + $0x88] sm:$0xff] }
 0x11f   : > { %v1828_v37 = vpop.eup %1827  ;;  %v393_v33 = vsel %vm392_vm8, %v2696_v44, %v391_v11  ;;  %v510_v38 = vmul.f32 %v1826_v16, %v2718_v60  ;;  %v508_v41 = vsel %vm506_vm7, %v507_v57, %v505_v28  ;;  %v573_v11 = vadd.f32 0.0001, %v541_v32  ;;  %v1878_v28 = vld [vmem:[%s2113_s17 + $0x90] sm:$0xff]  ;;  %v1882_v32 = vld [vmem:[%s2113_s17 + $0xa0] sm:$0xff] }
 0x120   : > { %v1830_v19 = vpop.eup %1829  ;;  %v398_v50 = vmul.f32 %v1828_v37, %v2723_v25  ;;  %v396_v3 = vsel %vm394_vm9, %v395_v39, %v393_v33  ;;  %v558_v39 = vmul.f32 0.35355338, %v508_v41  ;;  %v599_v59 = vmul.f32 %v1877_v63, %v2585_v21 }
 0x121   : > { %v1832_v24 = vpop.eup %1831  ;;  %v512_v6 = vsel %vm511_vm10, %v2718_v60, %v510_v38  ;;  %v517_v56 = vmul.f32 %v1830_v19, %v2739_v49  ;;  %1545 = vmatpush3.xpose.msk.msra.mxu0 %vm209_vm0, %v915_v13  ;;  %1626 = vmatpush3.xpose.msk.msra.mxu1 %vm209_vm0, %v915_v13  ;;  %v542_v20 = vmul.f32 0.35355338, %v396_v3  ;;  %1841 = vrcp.f32 %v589_v9 }
 0x122   : > { %v2872_v45 = vpop.eup %1833  ;;  %v515_v12 = vsel %vm513_vm11, %v514_v47, %v512_v6  ;;  %v400_v57 = vsel %vm399_vm12, %v2723_v25, %v398_v50  ;;  %v405_v44 = vmul.f32 %v1832_v24, %v2745_v17  ;;  %1546 = vmatprep.subr.msk.mxu0 %vm209_vm0, %v914_v29  ;;  %1611 = vmatprep.subr.msk.mxu1 %vm209_vm0, %v914_v29  ;;  %1843 = vrcp.f32 %v573_v11  ;;  %v1879_v50 = vld [vmem:[%s2113_s17 + $0x18] sm:$0xff] }
 0x123   : > { %v1836_v22 = vpop.eup %1835  ;;  %v403_v40 = vsel %vm401_vm13, %v402_v36, %v400_v57  ;;  %v519_v60 = vsel %vm518_vm14, %v2739_v49, %v517_v56  ;;  %v559_v58 = vmul.f32 0.35355338, %v515_v12  ;;  %v629_v49 = vmul.f32 %v1876_v52, %v2545_v55  ;;  %v1880_v24 = vld [vmem:[%s2113_s17 + $0x98] sm:$0xff]  ;;  %v1881_v56 = vld [vmem:[%s2113_s17 + $0x20] sm:$0xff] }
 0x124   : > { %v522_v35 = vsel %vm520_vm15, %v521_v53, %v519_v60  ;;  %v407_v47 = vsel %vm406_vm1, %v2745_v17, %v405_v44  ;;  %v1838_v25 = vpop.eup %1837  ;;  %v543_v13 = vmul.f32 0.35355338, %v403_v40  ;;  %v524_v7 = vmul.f32 %v1836_v22, %v2769_v27  ;;  %v1885_v22 = vld [vmem:[%s2113_s17 + $0x30] sm:$0xff]  ;;  %v1888_v60 = vld [vmem:[%s2113_s17 + $0xb8] sm:$0xff] }
 0x125   : > { %v410_v36 = vsel %vm408_vm2, %v409_v26, %v407_v47  ;;  %v2901_v53 = vpop.eup %1839  ;;  %v412_v2 = vmul.f32 %v1838_v25, %v2780_v1  ;;  %1547 = vmatpush3.xpose.msk.msra.mxu0 %vm209_vm0, %v914_v29  ;;  %1627 = vmatpush3.xpose.msk.msra.mxu1 %vm209_vm0, %v914_v29  ;;  %v590_v17 = vadd.f32 0.0001, %v558_v39  ;;  %v560_v16 = vmul.f32 0.35355338, %v522_v35  ;;  %v1886_v39 = vld [vmem:[%s2113_s17 + $0xb0] sm:$0xff]  ;;  %v1890_v35 = vld [vmem:[%s2113_s17 + $0xc0] sm:$0xff] }
 0x126   : > { %v631_v55 = vmul.f32 %v1878_v28, %v2563_v4  ;;  %v574_v26 = vadd.f32 0.0001, %v542_v20  ;;  %v544_v37 = vmul.f32 0.35355338, %v410_v36  ;;  %v526_v30 = vsel %vm525_vm3, %v2769_v27, %v524_v7  ;;  %v1891_v25 = vld [vmem:[%s2113_s17 + $0x48] sm:$0xff] }
 0x127   : > { %v414_v33 = vsel %vm413_vm5, %v2780_v1, %v412_v2  ;;  %v591_v38 = vadd.f32 0.0001, %v559_v58  ;;  %v529_v21 = vsel %vm527_vm4, %v528_v62, %v526_v30  ;;  %v575_v19 = vadd.f32 0.0001, %v543_v13  ;;  %v1892_v58 = vld [vmem:[%s2113_s17 + $0xc8] sm:$0xff] }
 0x128   : > { %v417_v4 = vsel %vm415_vm6, %v416_v61, %v414_v33  ;;  %1549 = vmatmul.mubr.msk.f32.vlgmr.msra.gmra.mxu0 %vm209_vm0, %v597_v10  ;;  %1573 = vmatmul.mubr.msk.f32.vlgmr.msra.gmra.mxu1 %vm209_vm0, %v629_v49  ;;  %v561_v41 = vmul.f32 0.35355338, %v529_v21  ;;  %v601_v27 = vmul.f32 %v1879_v50, %v2662_v18  ;;  %1845 = vrcp.f32 %v590_v17  ;;  %v1894_v10 = vld [vmem:[%s2113_s17 + $0xd0] sm:$0xff] }
 0x129   : > { %1551 = vmatprep.mubr.msk.f32.mxu0 %vm209_vm0, %v599_v59  ;;  %1575 = vmatprep.mubr.msk.f32.mxu1 %vm209_vm0, %v631_v55  ;;  %v592_v62 = vadd.f32 0.0001, %v560_v16  ;;  %v545_v1 = vmul.f32 0.35355338, %v417_v4  ;;  %v633_v3 = vmul.f32 %v1880_v24, %v2623_v31  ;;  %1847 = vrcp.f32 %v574_v26  ;;  %v1898_v16 = vld [vmem:[%s2113_s17 + $0xe0] sm:$0xff]  ;;  %v1899_v55 = vld [vmem:[%s2113_s17 + $0x68] sm:$0xff] }
 0x12a   : > { %v576_v6 = vadd.f32 0.0001, %v544_v37  ;;  %v603_v29 = vmul.f32 %v1881_v56, %v2729_v0  ;;  %v635_v12 = vmul.f32 %v1882_v32, %v2682_v34  ;;  %1849 = vrcp.f32 %v591_v38  ;;  %v1883_v0 = vld [vmem:[%s2113_s17 + $0x28] sm:$0xff]  ;;  %v1901_v38 = vld [vmem:[%s2113_s17 + $0x70] sm:$0xff] }
 0x12b   : > { %1851 = vrcp.f32 %v575_v19  ;;  %v593_v18 = vadd.f32 0.0001, %v561_v41  ;;  %v577_v31 = vadd.f32 0.0001, %v545_v1  ;;  %v605_v57 = vmul.f32 %v1883_v0, %v2747_v43  ;;  %v1884_v34 = vld [vmem:[%s2113_s17 + $0xa8] sm:$0xff]  ;;  %v1902_v4 = vld [vmem:[%s2113_s17 + $0xf0] sm:$0xff] }
 0x12c   : > { %1552 = vmatmul.mubr.msk.f32.gmra.mxu0 %vm209_vm0, %v601_v27  ;;  %1576 = vmatmul.mubr.msk.f32.gmra.mxu1 %vm209_vm0, %v633_v3  ;;  %1853 = vrcp.f32 %v592_v62  ;;  %v637_v44 = vmul.f32 %v1884_v34, %v2741_v14  ;;  %v607_v9 = vmul.f32 %v1885_v22, %v2761_v15  ;;  %v639_v40 = vmul.f32 %v1886_v39, %v2753_v23  ;;  %v1887_v14 = vld [vmem:[%s2113_s17 + $0x38] sm:$0xff]  ;;  %v1889_v23 = vld [vmem:[%s2113_s17 + $0x40] sm:$0xff]  ;;  %v1900_v37 = vld [vmem:[%s2113_s17 + $0xe8] sm:$0xff] }
 0x12d   : > { %1554 = vmatprep.mubr.msk.f32.mxu0 %vm209_vm0, %v603_v29  ;;  %1578 = vmatprep.mubr.msk.f32.mxu1 %vm209_vm0, %v635_v12  ;;  %1855 = vrcp.f32 %v576_v6  ;;  %v609_v43 = vmul.f32 %v1887_v14, %v2791_v46  ;;  %v641_v15 = vmul.f32 %v1888_v60, %v2777_v8  ;;  %v611_v20 = vmul.f32 %v1889_v23, %v2807_v51  ;;  %v1903_v41 = vld [vmem:[%s2113_s17 + $0x78] sm:$0xff] }
 0x12e   : > { %1857 = vrcp.f32 %v593_v18  ;;  %v643_v47 = vmul.f32 %v1890_v35, %v2799_v48  ;;  %v1842_v61 = vpop.eup %1841  ;;  %v613_v8 = vmul.f32 %v1891_v25, %v2835_v5  ;;  %v645_v51 = vmul.f32 %v1892_v58, %v2814_v42  ;;  %v1893_v48 = vld [vmem:[%s2113_s17 + $0x50] sm:$0xff]  ;;  %v1895_v5 = vld [vmem:[%s2113_s17 + $0x58] sm:$0xff] }
 0x12f   : > { %1859 = vrcp.f32 %v577_v31  ;;  %v1844_v46 = vpop.eup %1843  ;;  %v615_v54 = vmul.f32 %v1893_v48, %v2901_v53  ;;  %v647_v52 = vmul.f32 %v1894_v10, %v2872_v45  ;;  %v1896_v53 = vld [vmem:[%s2113_s17 + $0xd8] sm:$0xff]  ;;  %v1897_v45 = vld [vmem:[%s2113_s17 + $0x60] sm:$0xff] }
 0x130   : > { %1555 = vmatmul.mubr.msk.f32.gmra.mxu0 %vm209_vm0, %v605_v57  ;;  %1579 = vmatmul.mubr.msk.f32.gmra.mxu1 %vm209_vm0, %v637_v44  ;;  %v617_v13 = vmul.f32 %v1895_v5, %v1844_v46  ;;  %v649_v7 = vmul.f32 %v1896_v53, %v1842_v61  ;;  %v1904_v27 = vld [vmem:[%s2113_s17 + $0xf8] sm:$0xff]  ;;  %s1467_s17 = sshll.u32 %s2006_s13, 12  ;;  %s3041_s13 = scalar_lea.sflag [#allocation3], %s135_s26 }
 0x131   : > { %1557 = vmatprep.mubr.msk.f32.mxu0 %vm209_vm0, %v607_v9  ;;  %1581 = vmatprep.mubr.msk.f32.mxu1 %vm209_vm0, %v639_v40  ;;  %s3031_s4 = scalar_lea.hbm %s3083_s2, %s1467_s17 }
 0x134   : > { %1558 = vmatmul.mubr.msk.f32.gmra.mxu0 %vm209_vm0, %v609_v43  ;;  %1582 = vmatmul.mubr.msk.f32.gmra.mxu1 %vm209_vm0, %v641_v15 }
 0x135   : > { %1560 = vmatprep.mubr.msk.f32.mxu0 %vm209_vm0, %v611_v20  ;;  %1584 = vmatprep.mubr.msk.f32.mxu1 %vm209_vm0, %v643_v47  ;;  %v1846_v36 = vpop.eup %1845 }
 0x136   : > { %v1848_v49 = vpop.eup %1847  ;;  %v651_v63 = vmul.f32 %v1898_v16, %v1846_v36 }
 0x137   : > { %v1850_v11 = vpop.eup %1849  ;;  %v619_v17 = vmul.f32 %v1897_v45, %v1848_v49 }
 0x138   : > { %1561 = vmatmul.mubr.msk.f32.gmra.mxu0 %vm209_vm0, %v613_v8  ;;  %1585 = vmatmul.mubr.msk.f32.gmra.mxu1 %vm209_vm0, %v645_v51  ;;  %v1852_v42 = vpop.eup %1851  ;;  %v653_v30 = vmul.f32 %v1900_v37, %v1850_v11 }
 0x139   : > { %1563 = vmatprep.mubr.msk.f32.mxu0 %vm209_vm0, %v615_v54  ;;  %1587 = vmatprep.mubr.msk.f32.mxu1 %vm209_vm0, %v647_v52  ;;  %v1854_v2 = vpop.eup %1853  ;;  %v621_v26 = vmul.f32 %v1899_v55, %v1852_v42 }
 0x13a   : > { %v1856_v59 = vpop.eup %1855  ;;  %v655_v19 = vmul.f32 %v1902_v4, %v1854_v2 }
 0x13b   : > { %v1858_v28 = vpop.eup %1857  ;;  %v623_v21 = vmul.f32 %v1901_v38, %v1856_v59 }
 0x13c   : > { %1564 = vmatmul.mubr.msk.f32.gmra.mxu0 %vm209_vm0, %v617_v13  ;;  %1588 = vmatmul.mubr.msk.f32.gmra.mxu1 %vm209_vm0, %v649_v7  ;;  %v1860_v33 = vpop.eup %1859  ;;  %v657_v62 = vmul.f32 %v1904_v27, %v1858_v28 }
 0x13d   : > { %1566 = vmatprep.mubr.msk.f32.mxu0 %vm209_vm0, %v619_v17  ;;  %1590 = vmatprep.mubr.msk.f32.mxu1 %vm209_vm0, %v651_v63  ;;  %v625_v50 = vmul.f32 %v1903_v41, %v1860_v33 }
 0x140   : > { %1567 = vmatmul.mubr.msk.f32.gmra.mxu0 %vm209_vm0, %v621_v26  ;;  %1591 = vmatmul.mubr.msk.f32.gmra.mxu1 %vm209_vm0, %v653_v30 }
 0x141   : > { %1569 = vmatprep.mubr.msk.f32.mxu0 %vm209_vm0, %v623_v21  ;;  %1593 = vmatprep.mubr.msk.f32.mxu1 %vm209_vm0, %v655_v19 }
 0x144   : > { %1570 = vmatmul.mubr.msk.f32.gmra.mxu0 %vm209_vm0, %v625_v50  ;;  %1594 = vmatmul.mubr.msk.f32.gmra.mxu1 %vm209_vm0, %v657_v62 }
 0x1e8   : > { %v1550_v1 = vpop.f32.mrf.mxu0  ;;  %v1574_v24 = vpop.f32.mrf.mxu1 }
 0x1e9   : > { %1300 = vst [vmem:[%s2996_s28 + $0x8] sm:$0xff] %v1550_v1  ;;  %1316 = vst [vmem:[%s2996_s28 + $0x88] sm:$0xff] %v1574_v24 }
 0x1ea   : > { %v1140_v3 = vpop.f32.mrf.mxu0  ;;  %v1220_v6 = vpop.f32.mrf.mxu1 }
 0x1eb   : > { %1299 = vst [vmem:[%s2996_s28] sm:$0xff] %v1140_v3  ;;  %1315 = vst [vmem:[%s2996_s28 + $0x80] sm:$0xff] %v1220_v6 }
 0x1ec   : > { %v1553_v56 = vpop.f32.mrf.mxu0  ;;  %v1577_v29 = vpop.f32.mrf.mxu1 }
 0x1ed   : > { %1302 = vst [vmem:[%s2996_s28 + $0x18] sm:$0xff] %v1553_v56  ;;  %1318 = vst [vmem:[%s2996_s28 + $0x98] sm:$0xff] %v1577_v29 }
 0x1ee   : > { %v1150_v32 = vpop.f32.mrf.mxu0  ;;  %v1230_v12 = vpop.f32.mrf.mxu1 }
 0x1ef   : > { %1301 = vst [vmem:[%s2996_s28 + $0x10] sm:$0xff] %v1150_v32  ;;  %1317 = vst [vmem:[%s2996_s28 + $0x90] sm:$0xff] %v1230_v12 }
 0x1f0   : > { %v1556_v18 = vpop.f32.mrf.mxu0  ;;  %v1580_v31 = vpop.f32.mrf.mxu1 }
 0x1f1   : > { %1304 = vst [vmem:[%s2996_s28 + $0x28] sm:$0xff] %v1556_v18  ;;  %1320 = vst [vmem:[%s2996_s28 + $0xa8] sm:$0xff] %v1580_v31 }
 0x1f2   : > { %v1160_v0 = vpop.f32.mrf.mxu0  ;;  %v1240_v57 = vpop.f32.mrf.mxu1 }
 0x1f3   : > { %1303 = vst [vmem:[%s2996_s28 + $0x20] sm:$0xff] %v1160_v0  ;;  %1319 = vst [vmem:[%s2996_s28 + $0xa0] sm:$0xff] %v1240_v57 }
 0x1f4   : > { %v1559_v34 = vpop.f32.mrf.mxu0  ;;  %v1583_v44 = vpop.f32.mrf.mxu1 }
 0x1f5   : > { %1306 = vst [vmem:[%s2996_s28 + $0x38] sm:$0xff] %v1559_v34  ;;  %1322 = vst [vmem:[%s2996_s28 + $0xb8] sm:$0xff] %v1583_v44 }
 0x1f6   : > { %v1170_v22 = vpop.f32.mrf.mxu0  ;;  %v1250_v9 = vpop.f32.mrf.mxu1 }
 0x1f7   : > { %1305 = vst [vmem:[%s2996_s28 + $0x30] sm:$0xff] %v1170_v22  ;;  %1321 = vst [vmem:[%s2996_s28 + $0xb0] sm:$0xff] %v1250_v9 }
 0x1f8   : > { %v1562_v39 = vpop.f32.mrf.mxu0  ;;  %v1586_v40 = vpop.f32.mrf.mxu1 }
 0x1f9   : > { %1308 = vst [vmem:[%s2996_s28 + $0x48] sm:$0xff] %v1562_v39  ;;  %1324 = vst [vmem:[%s2996_s28 + $0xc8] sm:$0xff] %v1586_v40 }
 0x1fa   : > { %v1180_v14 = vpop.f32.mrf.mxu0  ;;  %v1260_v43 = vpop.f32.mrf.mxu1 }
 0x1fb   : > { %1307 = vst [vmem:[%s2996_s28 + $0x40] sm:$0xff] %v1180_v14  ;;  %1323 = vst [vmem:[%s2996_s28 + $0xc0] sm:$0xff] %v1260_v43 }
 0x1fc   : > { %v1565_v60 = vpop.f32.mrf.mxu0  ;;  %v1589_v15 = vpop.f32.mrf.mxu1 }
 0x1fd   : > { %1310 = vst [vmem:[%s2996_s28 + $0x58] sm:$0xff] %v1565_v60  ;;  %1326 = vst [vmem:[%s2996_s28 + $0xd8] sm:$0xff] %v1589_v15 }
 0x1fe   : > { %v1190_v23 = vpop.f32.mrf.mxu0  ;;  %v1270_v20 = vpop.f32.mrf.mxu1 }
 0x1ff   : > { %1309 = vst [vmem:[%s2996_s28 + $0x50] sm:$0xff] %v1190_v23  ;;  %1325 = vst [vmem:[%s2996_s28 + $0xd0] sm:$0xff] %v1270_v20 }
 0x200   : > { %v1568_v35 = vpop.f32.mrf.mxu0  ;;  %v1592_v47 = vpop.f32.mrf.mxu1 }
 0x201   : > { %1312 = vst [vmem:[%s2996_s28 + $0x68] sm:$0xff] %v1568_v35  ;;  %1328 = vst [vmem:[%s2996_s28 + $0xe8] sm:$0xff] %v1592_v47 }
 0x202   : > { %v1200_v61 = vpop.f32.mrf.mxu0  ;;  %v1280_v46 = vpop.f32.mrf.mxu1 }
 0x203   : > { %1311 = vst [vmem:[%s2996_s28 + $0x60] sm:$0xff] %v1200_v61  ;;  %1327 = vst [vmem:[%s2996_s28 + $0xe0] sm:$0xff] %v1280_v46 }
 0x204   : > { %v1571_v25 = vpop.f32.mrf.mxu0  ;;  %v1595_v8 = vpop.f32.mrf.mxu1 }
 0x205   : > { %1314 = vst [vmem:[%s2996_s28 + $0x78] sm:$0xff] %v1571_v25  ;;  %1330 = vst [vmem:[%s2996_s28 + $0xf8] sm:$0xff] %v1595_v8 }
 0x206   : > { %v1210_v58 = vpop.f32.mrf.mxu0  ;;  %v1290_v51 = vpop.f32.mrf.mxu1 }
 0x207   : > { %1313 = vst [vmem:[%s2996_s28 + $0x70] sm:$0xff] %v1210_v58  ;;  %1329 = vst [vmem:[%s2996_s28 + $0xf0] sm:$0xff] %v1290_v51 }
 0x208   : > { %1918 = shalt.err (!%p1915_p3)
}
 0x209   : > { %s1919_s16 = scalar_lea.hbm %s3031_s4, 4096  ;;  %s1923_s22 = scalar_lea.hbm %s3083_s2, 8192 }
 0x20a   : > { %p1920_p4 = scmp.ne.s32.totalorder %s3031_s4, %s1919_s16  ;;  %p1924_p9 = scmp.lt.s32.totalorder %s3031_s4, %s3083_s2 }
 0x20b   : > { %p1925_p10 = scmp.lt.s32.totalorder %s1923_s22, %s1919_s16 }
 0x20c   : > { %p1921_p7 = pnand %p1920_p4, %p2023_p5 }
 0x20d   : > { %p1926_p11 = por %p1925_p10, %p1924_p9 }
 0x20e   : > { %p1922_p8 = pneg %p1921_p7 }
 0x210   : > { %p1927_p12 = pnand %p1926_p11, %p1922_p8 }
 0x212   : > { %1930 = shalt.err (!%p1927_p12)
}
 0x213   : > { %s1968_s25 = smov 128   ;;  %s1969_s26 = smov 8  }
 0x214   : > { %1628 = dma.vmem_to_hbm [thread:$0]  (%p2023_p5), %s3033_s29, 4096, %s3031_s4, %s3041_s13, %s1968_s25, %s1968_s25, %s1969_s26  }
 0x215 PF: > { %p1634_p13 = scmp.ge.s32.totalorder %s1965_s12, 2  ;;  %s1360_s27 = sand.u32 1, %s1953_s9  }
 0x216   : > { %s1361_s28 = scalar_lea.sflag [#allocation3], %s1360_s27 }
 0x217   : > { %p1631_p0 = pnand %p1634_p13, %p2027_p6 }
 0x219   : > { %p1632_p1 = pneg %p1631_p0 }
 0x21b   : > { %1948 = dma.done.wait (%p1632_p1), %s1361_s28, 4096  }
 0x21c   : > { %1950 = vsyncadd (%p1632_p1), %s1361_s28, 4294963200  ;;  %p12_p2 = scmp.ge.s32.totalorder %s2010_s15, 4   ;;  %s3086_s9 = smov %s1957_s10 }
 0x21d   : > { %s3087_s10 = smov %s1961_s11  ;;  %s3088_s11 = smov %s2021_s18 }
 0x21e   : > { %s3089_s12 = smov %s2010_s15  ;;  %14 = sbr.rel (!%p12_p2) target bundleno = 3 (0x3), region = 63 }
 0x223   :  { %1366 = vsyncpa [#allocation3], 1 }
 0x224   :  { %1368 = vsyncpa [#allocation3 + $0x1], 1 }

</bundles_post_ra>
